<compile_context>
chip_gen: v7x
topology: tpu7x:2x2x1
jax: 0.10.0
libtpu: 0.0.40
codegen_flags: <defaults>
</compile_context>

<pallas_src>
import jax
import jax.numpy as jnp
from jax.experimental import pallas as pl
from jax.experimental.pallas import tpu as pltpu

_BN_EPS = 1e-5


# ----------------------------------------------------------------------------
# Fused kernel: conv1+BN+ReLU -> conv2+BN+ReLU -> deconv(2x2, stride 2)
# One grid step per block of B batch images; everything stays in VMEM.
# ----------------------------------------------------------------------------
def _fused_upsample_kernel(x_ref, t1_ref, s1_ref, t2_ref, s2_ref, d_ref, bt_ref,
                           o_ref, xp1_ref, xp2_ref):
    # x_ref:   (B, H, W*Cin)        image rows, channels-minor, lane-flattened
    # t1_ref:  (3*W*Cin, W*Cmid)    bf16 K-fused lowered conv1 weights (BN scale folded)
    # s1_ref:  (1, W*Cmid)          f32 folded BN shift, tiled over x
    # t2_ref:  (3*W*Cmid, W*Cout)   bf16 K-fused lowered conv2 weights
    # s2_ref:  (1, W*Cout)          f32
    # d_ref:   (W*Cout, 4*W*Cout)   bf16 parity-merged lowered deconv weights
    # bt_ref:  (1, 4*W*Cout)        f32 deconv bias, tiled
    # o_ref:   (B, H, 4*W*Cout)     row y of image b = [out row 2y | out row 2y+1],
    #                               each flattened over (2W, Cout)
    # xp1_ref: (B*(H+2), W*Cin)     f32 scratch: stacked per-image y-padded input
    # xp2_ref: (B*(H+2), W*Cmid)    f32 scratch: stacked per-image y-padded mid act
    f32 = jnp.float32
    bf16 = jnp.bfloat16
    B, H = x_ref.shape[0], x_ref.shape[1]
    M = xp1_ref.shape[0]                       # B * (H + 2)

    # --- per-image 1-row y-halos: zero only the 2*B halo rows (cheap), every
    #     step -> correct even when the parallel grid axis is core-partitioned.
    z1 = jnp.zeros((1, xp1_ref.shape[1]), f32)
    z2 = jnp.zeros((1, xp2_ref.shape[1]), f32)
    for b in range(B):
        base = b * (H + 2)
        xp1_ref[base:base + 1, :] = z1
        xp1_ref[base + H + 1:base + H + 2, :] = z1
        xp2_ref[base:base + 1, :] = z2
        xp2_ref[base + H + 1:base + H + 2, :] = z2

    # --- stack the B images (rows 1..H of each padded block) ------------------
    for b in range(B):
        base = b * (H + 2)
        xp1_ref[base + 1:base + 1 + H, :] = x_ref[b].astype(f32)

    # ---------------- conv1 (3x3, pad=1) + BN + ReLU ----------------
    # kx taps + x-halo are encoded in the block-Toeplitz weight; the 3 ky taps
    # are fused along K by lane-concatenating the 3 shifted row windows, so the
    # whole conv is ONE wide-K MXU matmul (bf16 in, f32 accumulate).
    lhs1 = jnp.concatenate(
        [xp1_ref[0:M - 2, :], xp1_ref[1:M - 1, :], xp1_ref[2:M, :]], axis=1)
    h = jnp.dot(lhs1.astype(bf16), t1_ref[...], preferred_element_type=f32)
    h = jnp.maximum(h + s1_ref[...], 0.0)              # f32 folded-BN shift + ReLU

    # valid rows of image b live at h[b*(H+2) : b*(H+2)+H]; seam rows are garbage
    for b in range(B):
        base = b * (H + 2)
        xp2_ref[base + 1:base + 1 + H, :] = h[base:base + H, :]

    # ---------------- conv2 (3x3, pad=1) + BN + ReLU ----------------
    lhs2 = jnp.concatenate(
        [xp2_ref[0:M - 2, :], xp2_ref[1:M - 1, :], xp2_ref[2:M, :]], axis=1)
    g = jnp.dot(lhs2.astype(bf16), t2_ref[...], preferred_element_type=f32)
    g = jnp.maximum(g + s2_ref[...], 0.0)

    # -------- ConvTranspose2d(kernel=2, stride=2): ONE parity-merged matmul ----
    y = jnp.dot(g.astype(bf16), d_ref[...], preferred_element_type=f32) + bt_ref[...]
    for b in range(B):
        base = b * (H + 2)
        o_ref[b] = y[base:base + H, :].astype(o_ref.dtype)


# ----------------------------------------------------------------------------
# Host-side weight lowering (trace-time, tiny matrices)
# ----------------------------------------------------------------------------
def _lower_conv3x3_weight(w_hwio, scale, W):
    """w_hwio: (3,3,Cin,Cout) HWIO; scale: (Cout,) folded BN scale.

    Returns T_cat: (3*W*Cin, W*Cout) bf16, the vertical concatenation over ky of
      T[ky, x'*Cin+ci, x*Cout+co] = w[ky, x'-x+1, ci, co]*scale[co] if |x'-x|<=1
    so `[win0 | win1 | win2] @ T_cat` performs the whole 3x3 conv (x-halo
    included) for all output x/co at once.
    """
    wf = (w_hwio * scale[None, None, None, :]).astype(jnp.float32)
    mats = []
    for ky in range(3):
        t = 0.0
        for kx in range(3):
            dx = kx - 1
            s = jnp.eye(W, k=-dx, dtype=jnp.float32)    # S[x', x] = 1 iff x' = x+dx
            t = t + jnp.kron(s, wf[ky, kx])
        mats.append(t)
    return jnp.concatenate(mats, axis=0).astype(jnp.bfloat16)


def _lower_deconv2x2_weight(wt_hwio, W):
    """wt_hwio: (2,2,C,Cout) HWIO.  Returns (W*C, 4*W*Cout) bf16: the lane
    concatenation over output parity ky of
      D[ky][x*C+ci, (2x+kx)*Cout+co] = wt[ky, kx, ci, co]
    so `h_row_y @ D_cat` yields [out row 2y | out row 2y+1], each (2W,Cout) flat."""
    mats = []
    idx = jnp.arange(W)
    for ky in range(2):
        d = 0.0
        for kx in range(2):
            p = jnp.zeros((W, 2 * W), jnp.float32).at[idx, 2 * idx + kx].set(1.0)
            d = d + jnp.kron(p, wt_hwio[ky, kx].astype(jnp.float32))
        mats.append(d)
    return jnp.concatenate(mats, axis=1).astype(jnp.bfloat16)


def _fold_bn(gamma, beta, mean, var, conv_bias):
    # eval-mode BN applied to (conv + bias):
    #   scale = gamma / sqrt(var + eps);  shift = beta + scale*(bias - mean)
    scale = gamma * jax.lax.rsqrt(var + _BN_EPS)
    shift = beta + scale * (conv_bias - mean)
    return scale, shift


def _pick_batch_block(n, h):
    """Largest divisor of n with B*(H+2) <= 256 (fills MXU M, bounded VMEM)."""
    best = 1
    for b in range(1, n + 1):
        if n % b == 0 and b * (h + 2) <= 256:
            best = b
    return best


# ----------------------------------------------------------------------------
# Parameters (deterministic, synthetic) + forward
# ----------------------------------------------------------------------------
def make_upsample_params(key, in_channels, mid_channels, out_channels):
    ks = jax.random.split(key, 10)
    return {
        # Conv2d(in, mid, 3, padding=1); weights kept HWIO = (kh,kw,Cin,Cout).
        # (Permute from PyTorch's (Cout,Cin,kh,kw) via (2,3,1,0) when porting.)
        "w1": 0.1 * jax.random.normal(ks[0], (3, 3, in_channels, mid_channels), jnp.float32),
        "b1": 0.1 * jax.random.normal(ks[1], (mid_channels,), jnp.float32),
        # BatchNorm2d(mid) -- eval mode running statistics
        "gamma1": 1.0 + 0.1 * jax.random.normal(ks[2], (mid_channels,), jnp.float32),
        "beta1": 0.1 * jax.random.normal(ks[3], (mid_channels,), jnp.float32),
        "mean1": jnp.zeros((mid_channels,), jnp.float32),
        "var1": jnp.ones((mid_channels,), jnp.float32),
        # Conv2d(mid, out, 3, padding=1)
        "w2": 0.1 * jax.random.normal(ks[4], (3, 3, mid_channels, out_channels), jnp.float32),
        "b2": 0.1 * jax.random.normal(ks[5], (out_channels,), jnp.float32),
        # BatchNorm2d(out)
        "gamma2": 1.0 + 0.1 * jax.random.normal(ks[6], (out_channels,), jnp.float32),
        "beta2": 0.1 * jax.random.normal(ks[7], (out_channels,), jnp.float32),
        "mean2": jnp.zeros((out_channels,), jnp.float32),
        "var2": jnp.ones((out_channels,), jnp.float32),
        # ConvTranspose2d(out, out, 2, stride=2); HWIO = (kh,kw,Cin,Cout).
        # (PyTorch stores (Cin,Cout,kh,kw) -- permute (2,3,0,1) when porting.)
        "wt": 0.1 * jax.random.normal(ks[8], (2, 2, out_channels, out_channels), jnp.float32),
        "bt": 0.1 * jax.random.normal(ks[9], (out_channels,), jnp.float32),
    }


@jax.jit
def upsample_forward(x_nchw, params):
    N, Cin, H, W = x_nchw.shape
    Cmid = params["w1"].shape[-1]
    Cout = params["w2"].shape[-1]
    B = _pick_batch_block(N, H)                     # images per grid step

    # NCHW -> NHWC -> (N, H, W*Cin): channels-minor rows, lane-flattened.
    x2d = jnp.transpose(x_nchw, (0, 2, 3, 1)).reshape(N, H, W * Cin)

    # Fold eval-mode BN into the conv weights (scale) and a per-channel shift.
    scale1, shift1 = _fold_bn(params["gamma1"], params["beta1"],
                              params["mean1"], params["var1"], params["b1"])
    scale2, shift2 = _fold_bn(params["gamma2"], params["beta2"],
                              params["mean2"], params["var2"], params["b2"])

    t1 = _lower_conv3x3_weight(params["w1"], scale1, W)   # (3*W*Cin,  W*Cmid) bf16
    t2 = _lower_conv3x3_weight(params["w2"], scale2, W)   # (3*W*Cmid, W*Cout) bf16
    dw = _lower_deconv2x2_weight(params["wt"], W)         # (W*Cout, 4*W*Cout) bf16
    s1_t = jnp.tile(shift1, W)[None, :].astype(jnp.float32)        # (1, W*Cmid)
    s2_t = jnp.tile(shift2, W)[None, :].astype(jnp.float32)        # (1, W*Cout)
    bt_t = jnp.tile(params["bt"], 4 * W)[None, :].astype(jnp.float32)  # (1, 4*W*Cout)

    flops = (2 * N * H * (3 * W * Cin) * (W * Cmid)
             + 2 * N * H * (3 * W * Cmid) * (W * Cout)
             + 2 * N * H * (W * Cout) * (4 * W * Cout))
    bytes_accessed = int(
        x2d.size * x2d.dtype.itemsize
        + (t1.size + t2.size + dw.size) * 2                 # bf16 weights
        + (s1_t.size + s2_t.size + bt_t.size) * 4
        + N * H * 4 * W * Cout * x_nchw.dtype.itemsize)

    out_flat = pl.pallas_call(
        _fused_upsample_kernel,
        out_shape=jax.ShapeDtypeStruct((N, H, 4 * W * Cout), x_nchw.dtype),
        grid=(N // B,),
        in_specs=[
            pl.BlockSpec((B, H, W * Cin), lambda n: (n, 0, 0)),
            # Grid-invariant weights (index_map constant).  On v7x with large
            # lowered weights, add pipeline_mode=pl.Buffered(1) to single-buffer.
            pl.BlockSpec((3 * W * Cin, W * Cmid), lambda n: (0, 0)),
            pl.BlockSpec((1, W * Cmid), lambda n: (0, 0)),
            pl.BlockSpec((3 * W * Cmid, W * Cout), lambda n: (0, 0)),
            pl.BlockSpec((1, W * Cout), lambda n: (0, 0)),
            pl.BlockSpec((W * Cout, 4 * W * Cout), lambda n: (0, 0)),
            pl.BlockSpec((1, 4 * W * Cout), lambda n: (0, 0)),
        ],
        out_specs=pl.BlockSpec((B, H, 4 * W * Cout), lambda n: (n, 0, 0)),
        scratch_shapes=[
            pltpu.VMEM((B * (H + 2), W * Cin), jnp.float32),
            pltpu.VMEM((B * (H + 2), W * Cmid), jnp.float32),
        ],
        compiler_params=pltpu.CompilerParams(dimension_semantics=("parallel",)),
        cost_estimate=pl.CostEstimate(flops=flops, transcendentals=0,
                                      bytes_accessed=bytes_accessed),
    )(x2d, t1, s1_t, t2, s2_t, dw, bt_t)

    # (N, H, 2*(2W*Cout)) -> (N, H, 2, 2W, Cout) -> (N, 2H, 2W, Cout): pure
    # row-major splits/merges (no data movement), then NHWC -> NCHW.
    y = out_flat.reshape(N, H, 2, 2 * W, Cout).reshape(N, 2 * H, 2 * W, Cout)
    return jnp.transpose(y, (0, 3, 1, 2))


# ----------------------------------------------------------------------------
# Pure-XLA reference (eval-mode BN) for a loose-tolerance correctness check.
# ----------------------------------------------------------------------------
def _batchnorm_eval(y, gamma, beta, mean, var):
    return (y - mean) * jax.lax.rsqrt(var + _BN_EPS) * gamma + beta


@jax.jit
def upsample_reference(x_nchw, params):
    x = jnp.transpose(x_nchw, (0, 2, 3, 1))                    # NHWC
    dn = ("NHWC", "HWIO", "NHWC")
    y = jax.lax.conv_general_dilated(x, params["w1"], (1, 1), "SAME",
                                     dimension_numbers=dn) + params["b1"]
    y = jnp.maximum(_batchnorm_eval(y, params["gamma1"], params["beta1"],
                                    params["mean1"], params["var1"]), 0.0)
    y = jax.lax.conv_general_dilated(y, params["w2"], (1, 1), "SAME",
                                     dimension_numbers=dn) + params["b2"]
    y = jnp.maximum(_batchnorm_eval(y, params["gamma2"], params["beta2"],
                                    params["mean2"], params["var2"]), 0.0)
    # ConvTranspose2d(k=2, s=2) is non-overlapping: direct einsum + interleave.
    n, h, w, _ = y.shape
    co = params["wt"].shape[-1]
    t = jnp.einsum("nhwc,klcd->nhkwld", y, params["wt"])       # (n,h,2,w,2,co)
    t = t.reshape(n, 2 * h, 2 * w, co) + params["bt"]
    return jnp.transpose(t, (0, 3, 1, 2))


if __name__ == "__main__":
    key = jax.random.PRNGKey(0)
    k_x, k_p = jax.random.split(key)

    N, Cin, H, W = 2, 4, 16, 16
    mid_channels, out_channels = 8, 8

    x = jax.random.normal(k_x, (N, Cin, H, W), jnp.float32)
    params = make_upsample_params(k_p, Cin, mid_channels, out_channels)

    y = jax.block_until_ready(upsample_forward(x, params))

    assert y.shape == (N, out_channels, 2 * H, 2 * W), y.shape
    assert y.dtype == jnp.float32

    # Correctness vs pure-XLA reference (bf16 MXU operands -> loose tolerance).
    y_ref = jax.block_until_ready(upsample_reference(x, params))
    err = float(jnp.max(jnp.abs(y - y_ref)))
    assert err < 5e-2, f"max abs error vs reference: {err}"

    print("KERNEL_OK")
</pallas_src>

<mosaic_0001>
module attributes {stable_mosaic.version = 11 : i64} {
  func.func @_fused_upsample_kernel(%arg0: i32, %arg1: memref<2x16x64xf32, #tpu.memory_space<vmem>>, %arg2: memref<192x128xbf16, #tpu.memory_space<vmem>>, %arg3: memref<1x128xf32, #tpu.memory_space<vmem>>, %arg4: memref<384x128xbf16, #tpu.memory_space<vmem>>, %arg5: memref<1x128xf32, #tpu.memory_space<vmem>>, %arg6: memref<128x512xbf16, #tpu.memory_space<vmem>>, %arg7: memref<1x512xf32, #tpu.memory_space<vmem>>, %arg8: memref<2x16x512xf32, #tpu.memory_space<vmem>>, %arg9: memref<36x64xf32, #tpu.memory_space<vmem>>, %arg10: memref<36x128xf32, #tpu.memory_space<vmem>>) attributes {dimension_semantics = [#tpu.dimension_semantics<parallel>], iteration_bounds = array<i64: 1>, scalar_prefetch = 0 : i64, scratch_operands = 2 : i64, tpu.core_type = #tpu.core_type<tc>, window_params = [{transform_indices = @transform_0, window_bounds = array<i64: 2, 16, 64>}, {pipeline_mode = #tpu.pipeline_mode<synchronous>, transform_indices = @transform_1, window_bounds = array<i64: 192, 128>}, {pipeline_mode = #tpu.pipeline_mode<synchronous>, transform_indices = @transform_2, window_bounds = array<i64: 1, 128>}, {pipeline_mode = #tpu.pipeline_mode<synchronous>, transform_indices = @transform_3, window_bounds = array<i64: 384, 128>}, {pipeline_mode = #tpu.pipeline_mode<synchronous>, transform_indices = @transform_4, window_bounds = array<i64: 1, 128>}, {pipeline_mode = #tpu.pipeline_mode<synchronous>, transform_indices = @transform_5, window_bounds = array<i64: 128, 512>}, {pipeline_mode = #tpu.pipeline_mode<synchronous>, transform_indices = @transform_6, window_bounds = array<i64: 1, 512>}, {transform_indices = @transform_7, window_bounds = array<i64: 2, 16, 512>}]} {
    %cst = arith.constant 0.000000e+00 : f32
    %0 = vector.broadcast %cst : f32 to vector<1x64xf32>
    %cst_0 = arith.constant 0.000000e+00 : f32
    %1 = vector.broadcast %cst_0 : f32 to vector<1x128xf32>
    %c0 = arith.constant 0 : index
    %c0_1 = arith.constant 0 : index
    %2 = vector.load %arg9[%c0, %c0_1] : memref<36x64xf32, #tpu.memory_space<vmem>>, vector<1x64xf32>
    tpu.vector_store %arg9[%c0, %c0_1], %0 {strides = array<i32>} : memref<36x64xf32, #tpu.memory_space<vmem>>, vector<1x64xf32>,
    %c17 = arith.constant 17 : index
    %c0_2 = arith.constant 0 : index
    %3 = vector.load %arg9[%c17, %c0_2] : memref<36x64xf32, #tpu.memory_space<vmem>>, vector<1x64xf32>
    tpu.vector_store %arg9[%c17, %c0_2], %0 {strides = array<i32>} : memref<36x64xf32, #tpu.memory_space<vmem>>, vector<1x64xf32>,
    %c0_3 = arith.constant 0 : index
    %c0_4 = arith.constant 0 : index
    %4 = vector.load %arg10[%c0_3, %c0_4] : memref<36x128xf32, #tpu.memory_space<vmem>>, vector<1x128xf32>
    tpu.vector_store %arg10[%c0_3, %c0_4], %1 {strides = array<i32>} : memref<36x128xf32, #tpu.memory_space<vmem>>, vector<1x128xf32>,
    %c17_5 = arith.constant 17 : index
    %c0_6 = arith.constant 0 : index
    %5 = vector.load %arg10[%c17_5, %c0_6] : memref<36x128xf32, #tpu.memory_space<vmem>>, vector<1x128xf32>
    tpu.vector_store %arg10[%c17_5, %c0_6], %1 {strides = array<i32>} : memref<36x128xf32, #tpu.memory_space<vmem>>, vector<1x128xf32>,
    %c18 = arith.constant 18 : index
    %c0_7 = arith.constant 0 : index
    %6 = vector.load %arg9[%c18, %c0_7] : memref<36x64xf32, #tpu.memory_space<vmem>>, vector<1x64xf32>
    tpu.vector_store %arg9[%c18, %c0_7], %0 {strides = array<i32>} : memref<36x64xf32, #tpu.memory_space<vmem>>, vector<1x64xf32>,
    %c35 = arith.constant 35 : index
    %c0_8 = arith.constant 0 : index
    %7 = vector.load %arg9[%c35, %c0_8] : memref<36x64xf32, #tpu.memory_space<vmem>>, vector<1x64xf32>
    tpu.vector_store %arg9[%c35, %c0_8], %0 {strides = array<i32>} : memref<36x64xf32, #tpu.memory_space<vmem>>, vector<1x64xf32>,
    %c18_9 = arith.constant 18 : index
    %c0_10 = arith.constant 0 : index
    %8 = vector.load %arg10[%c18_9, %c0_10] : memref<36x128xf32, #tpu.memory_space<vmem>>, vector<1x128xf32>
    tpu.vector_store %arg10[%c18_9, %c0_10], %1 {strides = array<i32>} : memref<36x128xf32, #tpu.memory_space<vmem>>, vector<1x128xf32>,
    %c35_11 = arith.constant 35 : index
    %c0_12 = arith.constant 0 : index
    %9 = vector.load %arg10[%c35_11, %c0_12] : memref<36x128xf32, #tpu.memory_space<vmem>>, vector<1x128xf32>
    tpu.vector_store %arg10[%c35_11, %c0_12], %1 {strides = array<i32>} : memref<36x128xf32, #tpu.memory_space<vmem>>, vector<1x128xf32>,
    %c0_13 = arith.constant 0 : index
    %c0_14 = arith.constant 0 : index
    %c0_15 = arith.constant 0 : index
    %10 = vector.load %arg1[%c0_13, %c0_14, %c0_15] : memref<2x16x64xf32, #tpu.memory_space<vmem>>, vector<1x16x64xf32>
    %11 = vector.shape_cast %10 : vector<1x16x64xf32> to vector<16x64xf32>
    %c1 = arith.constant 1 : index
    %c0_16 = arith.constant 0 : index
    %12 = vector.load %arg9[%c1, %c0_16] : memref<36x64xf32, #tpu.memory_space<vmem>>, vector<16x64xf32>
    tpu.vector_store %arg9[%c1, %c0_16], %11 {strides = array<i32>} : memref<36x64xf32, #tpu.memory_space<vmem>>, vector<16x64xf32>,
    %c1_17 = arith.constant 1 : index
    %c0_18 = arith.constant 0 : index
    %c0_19 = arith.constant 0 : index
    %13 = vector.load %arg1[%c1_17, %c0_18, %c0_19] : memref<2x16x64xf32, #tpu.memory_space<vmem>>, vector<1x16x64xf32>
    %14 = vector.shape_cast %13 : vector<1x16x64xf32> to vector<16x64xf32>
    %c19 = arith.constant 19 : index
    %c0_20 = arith.constant 0 : index
    %15 = vector.load %arg9[%c19, %c0_20] : memref<36x64xf32, #tpu.memory_space<vmem>>, vector<16x64xf32>
    tpu.vector_store %arg9[%c19, %c0_20], %14 {strides = array<i32>} : memref<36x64xf32, #tpu.memory_space<vmem>>, vector<16x64xf32>,
    %c0_21 = arith.constant 0 : index
    %c0_22 = arith.constant 0 : index
    %16 = vector.load %arg9[%c0_21, %c0_22] : memref<36x64xf32, #tpu.memory_space<vmem>>, vector<34x64xf32>
    %c1_23 = arith.constant 1 : index
    %c0_24 = arith.constant 0 : index
    %17 = vector.load %arg9[%c1_23, %c0_24] : memref<36x64xf32, #tpu.memory_space<vmem>>, vector<34x64xf32>
    %c2 = arith.constant 2 : index
    %c0_25 = arith.constant 0 : index
    %18 = vector.load %arg9[%c2, %c0_25] : memref<36x64xf32, #tpu.memory_space<vmem>>, vector<34x64xf32>
    %19 = tpu.concatenate %16, %17, %18 in 1 : vector<34x64xf32>, vector<34x64xf32>, vector<34x64xf32> -> vector<34x192xf32>
    %20 = arith.truncf %19 : vector<34x192xf32> to vector<34x192xbf16>
    %c0_26 = arith.constant 0 : index
    %c0_27 = arith.constant 0 : index
    %21 = vector.load %arg2[%c0_26, %c0_27] : memref<192x128xbf16, #tpu.memory_space<vmem>>, vector<192x128xbf16>
    %cst_28 = arith.constant dense<0.000000e+00> : vector<34x128xf32>
    %22 = tpu.matmul %20, %21, %cst_28 {dimension_numbers = #tpu.dot_dimension_numbers<[1], [0], [0], [1], [0, 0, 1, 1], [], []>} : vector<34x192xbf16>, vector<192x128xbf16>, vector<34x128xf32> -> vector<34x128xf32>
    %c0_29 = arith.constant 0 : index
    %c0_30 = arith.constant 0 : index
    %23 = vector.load %arg3[%c0_29, %c0_30] : memref<1x128xf32, #tpu.memory_space<vmem>>, vector<1x128xf32>
    %24 = vector.broadcast %23 : vector<1x128xf32> to vector<34x128xf32>
    %25 = arith.addf %22, %24 : vector<34x128xf32>
    %cst_31 = arith.constant 0.000000e+00 : f32
    %26 = vector.broadcast %cst_31 : f32 to vector<34x128xf32>
    %27 = arith.maximumf %25, %26 : vector<34x128xf32>
    %28 = vector.extract_strided_slice %27 {offsets = [0, 0], sizes = [16, 128], strides = [1, 1]} : vector<34x128xf32> to vector<16x128xf32>
    %c1_32 = arith.constant 1 : index
    %c0_33 = arith.constant 0 : index
    %29 = vector.load %arg10[%c1_32, %c0_33] : memref<36x128xf32, #tpu.memory_space<vmem>>, vector<16x128xf32>
    tpu.vector_store %arg10[%c1_32, %c0_33], %28 {strides = array<i32>} : memref<36x128xf32, #tpu.memory_space<vmem>>, vector<16x128xf32>,
    %30 = vector.extract_strided_slice %27 {offsets = [18, 0], sizes = [16, 128], strides = [1, 1]} : vector<34x128xf32> to vector<16x128xf32>
    %c19_34 = arith.constant 19 : index
    %c0_35 = arith.constant 0 : index
    %31 = vector.load %arg10[%c19_34, %c0_35] : memref<36x128xf32, #tpu.memory_space<vmem>>, vector<16x128xf32>
    tpu.vector_store %arg10[%c19_34, %c0_35], %30 {strides = array<i32>} : memref<36x128xf32, #tpu.memory_space<vmem>>, vector<16x128xf32>,
    %c0_36 = arith.constant 0 : index
    %c0_37 = arith.constant 0 : index
    %32 = vector.load %arg10[%c0_36, %c0_37] : memref<36x128xf32, #tpu.memory_space<vmem>>, vector<34x128xf32>
    %c1_38 = arith.constant 1 : index
    %c0_39 = arith.constant 0 : index
    %33 = vector.load %arg10[%c1_38, %c0_39] : memref<36x128xf32, #tpu.memory_space<vmem>>, vector<34x128xf32>
    %c2_40 = arith.constant 2 : index
    %c0_41 = arith.constant 0 : index
    %34 = vector.load %arg10[%c2_40, %c0_41] : memref<36x128xf32, #tpu.memory_space<vmem>>, vector<34x128xf32>
    %35 = tpu.concatenate %32, %33, %34 in 1 : vector<34x128xf32>, vector<34x128xf32>, vector<34x128xf32> -> vector<34x384xf32>
    %36 = arith.truncf %35 : vector<34x384xf32> to vector<34x384xbf16>
    %c0_42 = arith.constant 0 : index
    %c0_43 = arith.constant 0 : index
    %37 = vector.load %arg4[%c0_42, %c0_43] : memref<384x128xbf16, #tpu.memory_space<vmem>>, vector<384x128xbf16>
    %cst_44 = arith.constant dense<0.000000e+00> : vector<34x128xf32>
    %38 = tpu.matmul %36, %37, %cst_44 {dimension_numbers = #tpu.dot_dimension_numbers<[1], [0], [0], [1], [0, 0, 1, 1], [], []>} : vector<34x384xbf16>, vector<384x128xbf16>, vector<34x128xf32> -> vector<34x128xf32>
    %c0_45 = arith.constant 0 : index
    %c0_46 = arith.constant 0 : index
    %39 = vector.load %arg5[%c0_45, %c0_46] : memref<1x128xf32, #tpu.memory_space<vmem>>, vector<1x128xf32>
    %40 = vector.broadcast %39 : vector<1x128xf32> to vector<34x128xf32>
    %41 = arith.addf %38, %40 : vector<34x128xf32>
    %cst_47 = arith.constant 0.000000e+00 : f32
    %42 = vector.broadcast %cst_47 : f32 to vector<34x128xf32>
    %43 = arith.maximumf %41, %42 : vector<34x128xf32>
    %44 = arith.truncf %43 : vector<34x128xf32> to vector<34x128xbf16>
    %c0_48 = arith.constant 0 : index
    %c0_49 = arith.constant 0 : index
    %45 = vector.load %arg6[%c0_48, %c0_49] : memref<128x512xbf16, #tpu.memory_space<vmem>>, vector<128x512xbf16>
    %cst_50 = arith.constant dense<0.000000e+00> : vector<34x512xf32>
    %46 = tpu.matmul %44, %45, %cst_50 {dimension_numbers = #tpu.dot_dimension_numbers<[1], [0], [0], [1], [0, 0, 1, 1], [], []>} : vector<34x128xbf16>, vector<128x512xbf16>, vector<34x512xf32> -> vector<34x512xf32>
    %c0_51 = arith.constant 0 : index
    %c0_52 = arith.constant 0 : index
    %47 = vector.load %arg7[%c0_51, %c0_52] : memref<1x512xf32, #tpu.memory_space<vmem>>, vector<1x512xf32>
    %48 = vector.broadcast %47 : vector<1x512xf32> to vector<34x512xf32>
    %49 = arith.addf %46, %48 : vector<34x512xf32>
    %50 = vector.extract_strided_slice %49 {offsets = [0, 0], sizes = [16, 512], strides = [1, 1]} : vector<34x512xf32> to vector<16x512xf32>
    %c0_53 = arith.constant 0 : index
    %c0_54 = arith.constant 0 : index
    %c0_55 = arith.constant 0 : index
    %51 = vector.load %arg8[%c0_53, %c0_54, %c0_55] : memref<2x16x512xf32, #tpu.memory_space<vmem>>, vector<1x16x512xf32>
    %52 = vector.shape_cast %51 : vector<1x16x512xf32> to vector<16x512xf32>
    %53 = vector.shape_cast %50 : vector<16x512xf32> to vector<1x16x512xf32>
    tpu.vector_store %arg8[%c0_53, %c0_54, %c0_55], %53 {strides = array<i32>} : memref<2x16x512xf32, #tpu.memory_space<vmem>>, vector<1x16x512xf32>,
    %54 = vector.extract_strided_slice %49 {offsets = [18, 0], sizes = [16, 512], strides = [1, 1]} : vector<34x512xf32> to vector<16x512xf32>
    %c1_56 = arith.constant 1 : index
    %c0_57 = arith.constant 0 : index
    %c0_58 = arith.constant 0 : index
    %55 = vector.load %arg8[%c1_56, %c0_57, %c0_58] : memref<2x16x512xf32, #tpu.memory_space<vmem>>, vector<1x16x512xf32>
    %56 = vector.shape_cast %55 : vector<1x16x512xf32> to vector<16x512xf32>
    %57 = vector.shape_cast %54 : vector<16x512xf32> to vector<1x16x512xf32>
    tpu.vector_store %arg8[%c1_56, %c0_57, %c0_58], %57 {strides = array<i32>} : memref<2x16x512xf32, #tpu.memory_space<vmem>>, vector<1x16x512xf32>,
    return
  }
  func.func @transform_0(%arg0: i32) -> (i32, i32, i32) {
    %c0_i32 = arith.constant 0 : i32
    %c0_i32_0 = arith.constant 0 : i32
    %c0_i32_1 = arith.constant 0 : i32
    return %arg0, %c0_i32, %c0_i32_0 : i32, i32, i32
  }
  func.func @transform_1(%arg0: i32) -> (i32, i32) {
    %c0_i32 = arith.constant 0 : i32
    %c0_i32_0 = arith.constant 0 : i32
    %c0_i32_1 = arith.constant 0 : i32
    return %c0_i32, %c0_i32_0 : i32, i32
  }
  func.func @transform_2(%arg0: i32) -> (i32, i32) {
    %c0_i32 = arith.constant 0 : i32
    %c0_i32_0 = arith.constant 0 : i32
    %c0_i32_1 = arith.constant 0 : i32
    return %c0_i32, %c0_i32_0 : i32, i32
  }
  func.func @transform_3(%arg0: i32) -> (i32, i32) {
    %c0_i32 = arith.constant 0 : i32
    %c0_i32_0 = arith.constant 0 : i32
    %c0_i32_1 = arith.constant 0 : i32
    return %c0_i32, %c0_i32_0 : i32, i32
  }
  func.func @transform_4(%arg0: i32) -> (i32, i32) {
    %c0_i32 = arith.constant 0 : i32
    %c0_i32_0 = arith.constant 0 : i32
    %c0_i32_1 = arith.constant 0 : i32
    return %c0_i32, %c0_i32_0 : i32, i32
  }
  func.func @transform_5(%arg0: i32) -> (i32, i32) {
    %c0_i32 = arith.constant 0 : i32
    %c0_i32_0 = arith.constant 0 : i32
    %c0_i32_1 = arith.constant 0 : i32
    return %c0_i32, %c0_i32_0 : i32, i32
  }
  func.func @transform_6(%arg0: i32) -> (i32, i32) {
    %c0_i32 = arith.constant 0 : i32
    %c0_i32_0 = arith.constant 0 : i32
    %c0_i32_1 = arith.constant 0 : i32
    return %c0_i32, %c0_i32_0 : i32, i32
  }
  func.func @transform_7(%arg0: i32) -> (i32, i32, i32) {
    %c0_i32 = arith.constant 0 : i32
    %c0_i32_0 = arith.constant 0 : i32
    %c0_i32_1 = arith.constant 0 : i32
    return %arg0, %c0_i32, %c0_i32_0 : i32, i32, i32
  }
}

</mosaic_0001>

<bundles_post_ra>
// kernel: tile.18
= control target key start
LH: loop header
LB: loop body
LE: loop exit
PB: predicated region body
PF: predicated region fallthrough
CT: control target
= control target key end

     0   :  { %s28_s0 = inlined_call_operand.vmem [shape: f32[8], index: 0, kind: input, shape index: {}]   ;;  %s29_s1 = inlined_call_operand.vmem [shape: f32[16,8], index: 1, kind: output, shape index: {}]  }
   0x1   :  { %v4_v0 = vld [vmem:[%s28_s0] ss:$0 sm:$0xff] }
   0x2   :  { %5 = vst [vmem:[%s29_s1] sm:$0xff] %v4_v0  ;;  %8 = vst [vmem:[%s29_s1 + $0x8] sm:$0xff] %v4_v0 }

// kernel: tile.19
= control target key start
LH: loop header
LB: loop body
LE: loop exit
PB: predicated region body
PF: predicated region fallthrough
CT: control target
= control target key end

     0   :  { %s131_s10 = smov 120   ;;  %s132_s11 = smov 104   ;;  %vm3_vm0 = vcmask 64512   ;;  %vm9_vm1 = vcmask 1048512   ;;  %vm15_vm2 = vcmask 982912   ;;  %vm21_vm3 = vcmask 917312   ;;  %s207_s0 = inlined_call_operand.vmem [shape: f32[16,8], index: 0, kind: input, shape index: {}]   ;;  %s208_s1 = inlined_call_operand.vmem [shape: f32[1,128], index: 1, kind: output, shape index: {}]  }
   0x1   :  { %v101_v0 = vld [vmem:[%s207_s0 + $0xf] sm:$0x1]   ;;  %v103_v1 = vld [vmem:[%s207_s0 + $0xd] sm:$0x1]   ;;  %v102_v2 = vld [vmem:[%s207_s0 + $0xe] sm:$0x1]  }
   0x2   :  { %7 = vrot.lane.b32.xlu0 %v101_v0, %s131_s10  ;;  %19 = vrot.lane.b32.xlu1 %v103_v1, %s132_s11  ;;  %v104_v3 = vld [vmem:[%s207_s0 + $0xc] sm:$0x1]   ;;  %s133_s16 = smov 112   ;;  %s134_s17 = smov 96   ;;  %v105_v4 = vld [vmem:[%s207_s0 + $0xb] sm:$0x1]  }
   0x3   :  { %v106_v5 = vld [vmem:[%s207_s0 + $0xa] sm:$0x1]   ;;  %v2_v6 = vld [vmem:[%s207_s0] sm:$0x1]   ;;  %s135_s24 = smov 88   ;;  %s136_s25 = smov 80  }
   0x4   :  { %4 = vst.msk [vmem:[#allocation0] sm:$0x1] %vm3_vm0, %v2_v6   ;;  %v107_v7 = vld [vmem:[%s207_s0 + $0x9] sm:$0x1]   ;;  %v108_v8 = vld [vmem:[%s207_s0 + $0x8] sm:$0x1]  }
   0x5   :  { %s137_s30 = smov 72   ;;  %s138_s2 = smov 64   ;;  %v109_v9 = vld [vmem:[%s207_s0 + $0x7] sm:$0x1]   ;;  %v110_v10 = vld [vmem:[%s207_s0 + $0x6] sm:$0x1]  }
   0x6   :  { %13 = vrot.lane.b32.xlu0 %v102_v2, %s133_s16  ;;  %25 = vrot.lane.b32.xlu1 %v104_v3, %s134_s17  ;;  %s139_s7 = smov 56   ;;  %s140_s8 = smov 48   ;;  %v111_v11 = vld [vmem:[%s207_s0 + $0x5] sm:$0x1]   ;;  %v112_v12 = vld [vmem:[%s207_s0 + $0x4] sm:$0x1]  }
   0x7   :  { %s141_s13 = smov 40   ;;  %s142_s14 = smov 32   ;;  %v113_v13 = vld [vmem:[%s207_s0 + $0x3] sm:$0x1]   ;;  %v114_v14 = vld [vmem:[%s207_s0 + $0x2] sm:$0x1]  }
   0x8   :  { %s143_s19 = smov 24   ;;  %s144_s20 = smov 16   ;;  %v115_v15 = vld [vmem:[%s207_s0 + $0x1] sm:$0x1]   ;;  %vm27_vm4 = vcmask 851712   ;;  %vm33_vm5 = vcmask 786112  }
   0x9   :  { %s145_s0 = smov 8   ;;  %vm39_vm6 = vcmask 720512   ;;  %vm45_vm7 = vcmask 654912   ;;  %vm51_vm8 = vcmask 589312   ;;  %vm57_vm9 = vcmask 523712  }
   0xa   :  { %31 = vrot.lane.b32.xlu0 %v105_v4, %s135_s24  ;;  %37 = vrot.lane.b32.xlu1 %v106_v5, %s136_s25  ;;  %vm63_vm10 = vcmask 458112   ;;  %vm69_vm11 = vcmask 392512   ;;  %vm75_vm12 = vcmask 326912   ;;  %vm81_vm13 = vcmask 261312  }
   0xb   :  { %vm87_vm14 = vcmask 195712   ;;  %vm93_vm15 = vcmask 130112  }
   0xe   :  { %43 = vrot.lane.b32.xlu0 %v107_v7, %s137_s30  ;;  %49 = vrot.lane.b32.xlu1 %v108_v8, %s138_s2 }
  0x12   :  { %55 = vrot.lane.b32.xlu0 %v109_v9, %s139_s7  ;;  %61 = vrot.lane.b32.xlu1 %v110_v10, %s140_s8 }
  0x16   :  { %67 = vrot.lane.b32.xlu0 %v111_v11, %s141_s13  ;;  %73 = vrot.lane.b32.xlu1 %v112_v12, %s142_s14 }
  0x1a   :  { %79 = vrot.lane.b32.xlu0 %v113_v13, %s143_s19  ;;  %85 = vrot.lane.b32.xlu1 %v114_v14, %s144_s20 }
  0x1e   :  { %91 = vrot.lane.b32.xlu0 %v115_v15, %s145_s0 }
  0x74   :  { %v8_v16 = vpop.permute.xlu0 %7   ;;  %v20_v17 = vpop.permute.xlu1 %19  }
  0x75   :  { %10 = vst.msk [vmem:[#allocation0] sm:$0x1] %vm9_vm1, %v8_v16  }
  0x78   :  { %v14_v18 = vpop.permute.xlu0 %13   ;;  %v26_v19 = vpop.permute.xlu1 %25  }
  0x79   :  { %16 = vst.msk [vmem:[#allocation0] sm:$0x1] %vm15_vm2, %v14_v18  }
  0x7a   :  { %22 = vst.msk [vmem:[#allocation0] sm:$0x1] %vm21_vm3, %v20_v17  }
  0x7b   :  { %28 = vst.msk [vmem:[#allocation0] sm:$0x1] %vm27_vm4, %v26_v19  }
  0x7c   :  { %v32_v20 = vpop.permute.xlu0 %31   ;;  %v38_v21 = vpop.permute.xlu1 %37  }
  0x7d   :  { %34 = vst.msk [vmem:[#allocation0] sm:$0x1] %vm33_vm5, %v32_v20  }
  0x7e   :  { %40 = vst.msk [vmem:[#allocation0] sm:$0x1] %vm39_vm6, %v38_v21  }
  0x80   :  { %v44_v22 = vpop.permute.xlu0 %43   ;;  %v50_v23 = vpop.permute.xlu1 %49  }
  0x81   :  { %46 = vst.msk [vmem:[#allocation0] sm:$0x1] %vm45_vm7, %v44_v22  }
  0x82   :  { %52 = vst.msk [vmem:[#allocation0] sm:$0x1] %vm51_vm8, %v50_v23  }
  0x84   :  { %v56_v24 = vpop.permute.xlu0 %55   ;;  %v62_v25 = vpop.permute.xlu1 %61  }
  0x85   :  { %58 = vst.msk [vmem:[#allocation0] sm:$0x1] %vm57_vm9, %v56_v24  }
  0x86   :  { %64 = vst.msk [vmem:[#allocation0] sm:$0x1] %vm63_vm10, %v62_v25  }
  0x88   :  { %v68_v26 = vpop.permute.xlu0 %67   ;;  %v74_v27 = vpop.permute.xlu1 %73  }
  0x89   :  { %70 = vst.msk [vmem:[#allocation0] sm:$0x1] %vm69_vm11, %v68_v26  }
  0x8a   :  { %76 = vst.msk [vmem:[#allocation0] sm:$0x1] %vm75_vm12, %v74_v27  }
  0x8c   :  { %v80_v28 = vpop.permute.xlu0 %79   ;;  %v86_v29 = vpop.permute.xlu1 %85  }
  0x8d   :  { %82 = vst.msk [vmem:[#allocation0] sm:$0x1] %vm81_vm13, %v80_v28  }
  0x8e   :  { %88 = vst.msk [vmem:[#allocation0] sm:$0x1] %vm87_vm14, %v86_v29  }
  0x90   :  { %v92_v30 = vpop.permute.xlu0 %91  }
  0x91   :  { %94 = vst.msk [vmem:[#allocation0] sm:$0x1] %vm93_vm15, %v92_v30  }
  0x98   :  { %v98_v31 = vld [vmem:[#allocation0] sm:$0x1] }
  0x99   :  { %100 = vst [vmem:[%s208_s1] sm:$0x1] %v98_v31 }

// kernel: tile.28
= control target key start
LH: loop header
LB: loop body
LE: loop exit
PB: predicated region body
PF: predicated region fallthrough
CT: control target
= control target key end

     0   :  { %s64_s0 = inlined_call_operand.vmem [shape: f32[8], index: 0, kind: input, shape index: {}]   ;;  %s65_s1 = inlined_call_operand.vmem [shape: f32[64,8], index: 1, kind: output, shape index: {}]  }
   0x1   :  { %v4_v0 = vld [vmem:[%s64_s0] ss:$0 sm:$0xff] }
   0x2   :  { %5 = vst [vmem:[%s65_s1] sm:$0xff] %v4_v0  ;;  %20 = vst [vmem:[%s65_s1 + $0x8] sm:$0xff] %v4_v0 }
   0x3   :  { %21 = vst [vmem:[%s65_s1 + $0x10] sm:$0xff] %v4_v0  ;;  %22 = vst [vmem:[%s65_s1 + $0x18] sm:$0xff] %v4_v0 }
   0x4   :  { %23 = vst [vmem:[%s65_s1 + $0x20] sm:$0xff] %v4_v0  ;;  %24 = vst [vmem:[%s65_s1 + $0x28] sm:$0xff] %v4_v0 }
   0x5   :  { %25 = vst [vmem:[%s65_s1 + $0x30] sm:$0xff] %v4_v0  ;;  %26 = vst [vmem:[%s65_s1 + $0x38] sm:$0xff] %v4_v0 }

// kernel: tile.29
= control target key start
LH: loop header
LB: loop body
LE: loop exit
PB: predicated region body
PF: predicated region fallthrough
CT: control target
= control target key end

     0   :  { %vm6_vm0 = vcmask 1043458   ;;  %s11_s6 = smov 3  ;;  %s14_s7 = smov 12  ;;  %vm8_vm1 = vcmask 64512   ;;  %vm20_vm2 = vcmask 1048512   ;;  %vm32_vm3 = vcmask 982912   ;;  %s412_s0 = inlined_call_operand.vmem [shape: f32[64,8], index: 0, kind: input, shape index: {}]   ;;  %s413_s1 = inlined_call_operand.vmem [shape: f32[1,512], index: 1, kind: output, shape index: {}]  }
   0x1   :  { %v215_v0 = vld [vmem:[%s412_s0 + $0xf] ss:$16 sm:%s11_s6]   ;;  %s35_s12 = smov 3  ;;  %s38_s15 = smov 12  ;;  %vm44_vm4 = vcmask 917312   ;;  %vm56_vm5 = vcmask 851712  }
   0x2   :  { %v216_v1 = vld [vmem:[%s412_s0 + $0xf] ss:$16 sm:%s14_s7]   ;;  %v219_v3 = vld [vmem:[%s412_s0 + $0xd] ss:$16 sm:%s35_s12]   ;;  %s263_s16 = smov 120   ;;  %s23_s19 = smov 3 }
   0x3   :  { %v17_v2 = vsel %vm6_vm0, %v216_v1, %v215_v0  ;;  %v220_v4 = vld [vmem:[%s412_s0 + $0xd] ss:$16 sm:%s38_s15]   ;;  %s26_s20 = smov 12  ;;  %v217_v6 = vld [vmem:[%s412_s0 + $0xe] ss:$16 sm:%s23_s19]   ;;  %s47_s25 = smov 3 }
   0x4   :  { %18 = vrot.lane.b32.xlu0 %v17_v2, %s263_s16  ;;  %v41_v5 = vsel %vm6_vm0, %v220_v4, %v219_v3  ;;  %v218_v7 = vld [vmem:[%s412_s0 + $0xe] ss:$16 sm:%s26_s20]   ;;  %s264_s26 = smov 104   ;;  %s50_s29 = smov 12  ;;  %vm68_vm6 = vcmask 786112   ;;  %vm80_vm7 = vcmask 720512  }
   0x5   :  { %42 = vrot.lane.b32.xlu1 %v41_v5, %s264_s26  ;;  %v29_v8 = vsel %vm6_vm0, %v218_v7, %v217_v6  ;;  %v221_v9 = vld [vmem:[%s412_s0 + $0xc] ss:$16 sm:%s47_s25]   ;;  %s59_s3 = smov 3  ;;  %s62_s4 = smov 12  ;;  %vm92_vm8 = vcmask 654912   ;;  %vm104_vm9 = vcmask 589312  }
   0x6   :  { %v222_v10 = vld [vmem:[%s412_s0 + $0xc] ss:$16 sm:%s50_s29]   ;;  %s265_s5 = smov 112   ;;  %v223_v12 = vld [vmem:[%s412_s0 + $0xb] ss:$16 sm:%s59_s3]   ;;  %s71_s8 = smov 3 }
   0x7   :  { %v53_v11 = vsel %vm6_vm0, %v222_v10, %v221_v9  ;;  %v224_v13 = vld [vmem:[%s412_s0 + $0xb] ss:$16 sm:%s62_s4]   ;;  %v225_v14 = vld [vmem:[%s412_s0 + $0xa] ss:$16 sm:%s71_s8]   ;;  %s74_s13 = smov 12  ;;  %s266_s14 = smov 96  }
   0x8   :  { %30 = vrot.lane.b32.xlu0 %v29_v8, %s265_s5  ;;  %v65_v15 = vsel %vm6_vm0, %v224_v13, %v223_v12  ;;  %v226_v16 = vld [vmem:[%s412_s0 + $0xa] ss:$16 sm:%s74_s13]   ;;  %s83_s17 = smov 3  ;;  %s86_s18 = smov 12  ;;  %vm116_vm10 = vcmask 523712   ;;  %vm128_vm11 = vcmask 458112  }
   0x9   :  { %54 = vrot.lane.b32.xlu1 %v53_v11, %s266_s14  ;;  %v77_v17 = vsel %vm6_vm0, %v226_v16, %v225_v14  ;;  %v227_v18 = vld [vmem:[%s412_s0 + $0x9] ss:$16 sm:%s83_s17]   ;;  %s95_s23 = smov 3  ;;  %s267_s24 = smov 88   ;;  %vm140_vm12 = vcmask 392512   ;;  %vm152_vm13 = vcmask 326912  }
   0xa   :  { %v228_v19 = vld [vmem:[%s412_s0 + $0x9] ss:$16 sm:%s86_s18]   ;;  %v229_v20 = vld [vmem:[%s412_s0 + $0x8] ss:$16 sm:%s95_s23]   ;;  %s98_s27 = smov 12  ;;  %s107_s30 = smov 3 }
   0xb   :  { %v89_v21 = vsel %vm6_vm0, %v228_v19, %v227_v18  ;;  %v230_v22 = vld [vmem:[%s412_s0 + $0x8] ss:$16 sm:%s98_s27]   ;;  %s110_s2 = smov 12  ;;  %s268_s3 = smov 80   ;;  %v231_v23 = vld [vmem:[%s412_s0 + $0x7] ss:$16 sm:%s107_s30]  }
   0xc   :  { %66 = vrot.lane.b32.xlu0 %v65_v15, %s267_s24  ;;  %s119_s6 = smov 3  ;;  %v101_v24 = vsel %vm6_vm0, %v230_v22, %v229_v20  ;;  %v232_v25 = vld [vmem:[%s412_s0 + $0x7] ss:$16 sm:%s110_s2]   ;;  %s122_s11 = smov 12  ;;  %vm164_vm14 = vcmask 261312   ;;  %vm176_vm15 = vcmask 195712  }
   0xd   :  { %78 = vrot.lane.b32.xlu1 %v77_v17, %s268_s3  ;;  %v233_v26 = vld [vmem:[%s412_s0 + $0x6] ss:$16 sm:%s119_s6]   ;;  %s269_s12 = smov 72   ;;  %s131_s15 = smov 3  ;;  %v113_v28 = vsel %vm6_vm0, %v232_v25, %v231_v23 }
   0xe   :  { %v234_v27 = vld [vmem:[%s412_s0 + $0x6] ss:$16 sm:%s122_s11]   ;;  %s134_s16 = smov 12  ;;  %v235_v29 = vld [vmem:[%s412_s0 + $0x5] ss:$16 sm:%s131_s15]   ;;  %s143_s19 = smov 3 }
   0xf   :  { %s270_s20 = smov 64   ;;  %v236_v30 = vld [vmem:[%s412_s0 + $0x5] ss:$16 sm:%s134_s16]   ;;  %s146_s23 = smov 12  ;;  %v125_v31 = vsel %vm6_vm0, %v234_v27, %v233_v26  ;;  %v237_v32 = vld [vmem:[%s412_s0 + $0x4] ss:$16 sm:%s143_s19]  }
  0x10   :  { %90 = vrot.lane.b32.xlu0 %v89_v21, %s269_s12  ;;  %s155_s26 = smov 3  ;;  %s158_s27 = smov 12  ;;  %v238_v33 = vld [vmem:[%s412_s0 + $0x4] ss:$16 sm:%s146_s23]   ;;  %v137_v34 = vsel %vm6_vm0, %v236_v30, %v235_v29 }
  0x11   :  { %102 = vrot.lane.b32.xlu1 %v101_v24, %s270_s20  ;;  %s271_s28 = smov 56   ;;  %s167_s2 = smov 3  ;;  %v239_v35 = vld [vmem:[%s412_s0 + $0x3] ss:$16 sm:%s155_s26]   ;;  %v149_v37 = vsel %vm6_vm0, %v238_v33, %v237_v32 }
  0x12   :  { %s170_s5 = smov 12  ;;  %s272_s6 = smov 48   ;;  %v240_v36 = vld [vmem:[%s412_s0 + $0x3] ss:$16 sm:%s158_s27]   ;;  %v241_v38 = vld [vmem:[%s412_s0 + $0x2] ss:$16 sm:%s167_s2]  }
  0x13   :  { %s179_s9 = smov 3  ;;  %v242_v39 = vld [vmem:[%s412_s0 + $0x2] ss:$16 sm:%s170_s5]   ;;  %s182_s14 = smov 12  ;;  %v161_v41 = vsel %vm6_vm0, %v240_v36, %v239_v35 }
  0x14   :  { %114 = vrot.lane.b32.xlu0 %v113_v28, %s271_s28  ;;  %s2_s15 = smov 3  ;;  %s273_s16 = smov 40   ;;  %v243_v42 = vld [vmem:[%s412_s0 + $0x1] ss:$16 sm:%s179_s9]   ;;  %v173_v46 = vsel %vm6_vm0, %v242_v39, %v241_v38 }
  0x15   :  { %126 = vrot.lane.b32.xlu1 %v125_v31, %s272_s6  ;;  %v3_v40 = vld [vmem:[%s412_s0] ss:$16 sm:%s2_s15]   ;;  %s4_s19 = smov 12  ;;  %s274_s24 = smov 32  }
  0x16   :  { %v5_v43 = vld [vmem:[%s412_s0] ss:$16 sm:%s4_s19]   ;;  %v244_v44 = vld [vmem:[%s412_s0 + $0x1] ss:$16 sm:%s182_s14]   ;;  %s275_s0 = smov 24   ;;  %s276_s27 = smov 16  }
  0x17   :  { %v7_v45 = vsel %vm6_vm0, %v5_v43, %v3_v40  ;;  %v185_v47 = vsel %vm6_vm0, %v244_v44, %v243_v42  ;;  %s277_s28 = smov 8   ;;  %vm188_vm0 = vcmask 130112  }
  0x18   :  { %138 = vrot.lane.b32.xlu0 %v137_v34, %s273_s16  ;;  %9 = vst.msk [vmem:[#allocation0] ss:$8 sm:$0xf] %vm8_vm1, %v7_v45  }
  0x19   :  { %150 = vrot.lane.b32.xlu1 %v149_v37, %s274_s24 }
  0x1c   :  { %162 = vrot.lane.b32.xlu0 %v161_v41, %s275_s0 }
  0x1d   :  { %174 = vrot.lane.b32.xlu1 %v173_v46, %s276_s27 }
  0x20   :  { %186 = vrot.lane.b32.xlu0 %v185_v47, %s277_s28 }
  0x76   :  { %v19_v48 = vpop.permute.xlu0 %18  }
  0x77   :  { %21 = vst.msk [vmem:[#allocation0] ss:$8 sm:$0xf] %vm20_vm2, %v19_v48   ;;  %v43_v49 = vpop.permute.xlu1 %42  }
  0x7a   :  { %v31_v50 = vpop.permute.xlu0 %30  }
  0x7b   :  { %33 = vst.msk [vmem:[#allocation0] ss:$8 sm:$0xf] %vm32_vm3, %v31_v50   ;;  %v55_v51 = vpop.permute.xlu1 %54  }
  0x7c   :  { %45 = vst.msk [vmem:[#allocation0] ss:$8 sm:$0xf] %vm44_vm4, %v43_v49  }
  0x7d   :  { %57 = vst.msk [vmem:[#allocation0] ss:$8 sm:$0xf] %vm56_vm5, %v55_v51  }
  0x7e   :  { %v67_v52 = vpop.permute.xlu0 %66  }
  0x7f   :  { %69 = vst.msk [vmem:[#allocation0] ss:$8 sm:$0xf] %vm68_vm6, %v67_v52   ;;  %v79_v53 = vpop.permute.xlu1 %78  }
  0x80   :  { %81 = vst.msk [vmem:[#allocation0] ss:$8 sm:$0xf] %vm80_vm7, %v79_v53  }
  0x82   :  { %v91_v54 = vpop.permute.xlu0 %90  }
  0x83   :  { %93 = vst.msk [vmem:[#allocation0] ss:$8 sm:$0xf] %vm92_vm8, %v91_v54   ;;  %v103_v55 = vpop.permute.xlu1 %102  }
  0x84   :  { %105 = vst.msk [vmem:[#allocation0] ss:$8 sm:$0xf] %vm104_vm9, %v103_v55  }
  0x86   :  { %v115_v56 = vpop.permute.xlu0 %114  }
  0x87   :  { %117 = vst.msk [vmem:[#allocation0] ss:$8 sm:$0xf] %vm116_vm10, %v115_v56   ;;  %v127_v57 = vpop.permute.xlu1 %126  }
  0x88   :  { %129 = vst.msk [vmem:[#allocation0] ss:$8 sm:$0xf] %vm128_vm11, %v127_v57  }
  0x8a   :  { %v139_v58 = vpop.permute.xlu0 %138  }
  0x8b   :  { %141 = vst.msk [vmem:[#allocation0] ss:$8 sm:$0xf] %vm140_vm12, %v139_v58   ;;  %v151_v59 = vpop.permute.xlu1 %150  }
  0x8c   :  { %153 = vst.msk [vmem:[#allocation0] ss:$8 sm:$0xf] %vm152_vm13, %v151_v59  }
  0x8e   :  { %v163_v60 = vpop.permute.xlu0 %162  }
  0x8f   :  { %165 = vst.msk [vmem:[#allocation0] ss:$8 sm:$0xf] %vm164_vm14, %v163_v60   ;;  %v175_v61 = vpop.permute.xlu1 %174  }
  0x90   :  { %177 = vst.msk [vmem:[#allocation0] ss:$8 sm:$0xf] %vm176_vm15, %v175_v61  }
  0x92   :  { %v187_v62 = vpop.permute.xlu0 %186  }
  0x93   :  { %189 = vst.msk [vmem:[#allocation0] ss:$8 sm:$0xf] %vm188_vm0, %v187_v62  }
  0x9a   :  { %v193_v63 = vld [vmem:[#allocation0] sm:$0x1]  ;;  %v197_v0 = vld [vmem:[#allocation0 + $0x8] sm:$0x1]  ;;  %v202_v1 = vld [vmem:[#allocation0 + $0x10] sm:$0x1] }
  0x9b   :  { %195 = vst [vmem:[%s413_s1] sm:$0x1] %v193_v63  ;;  %245 = vst [vmem:[%s413_s1 + $0x1] sm:$0x1] %v197_v0  ;;  %v208_v2 = vld [vmem:[#allocation0 + $0x18] sm:$0x1] }
  0x9c   :  { %246 = vst [vmem:[%s413_s1 + $0x2] sm:$0x1] %v202_v1  ;;  %247 = vst [vmem:[%s413_s1 + $0x3] sm:$0x1] %v208_v2 }

// kernel: upsample_forward.1
= control target key start
LH: loop header
LB: loop body
LE: loop exit
PB: predicated region body
PF: predicated region fallthrough
CT: control target
= control target key end

     0   :  { %vm38_vm0 = vcmask 523264   ;;  %vm27_vm1 = vcmask 516096   ;;  %v1265_v2 = vmov 0.0   ;;  %v1266_v4 = vmov 0   ;;  %s1670_s0 = inlined_call_operand.vmem [shape: f32[2,16,64], index: 0, kind: input, shape index: {}]   ;;  %s1671_s1 = inlined_call_operand.vmem [shape: bf16[192,128], index: 1, kind: input, shape index: {}]   ;;  %s1672_s3 = inlined_call_operand.vmem [shape: bf16[384,128], index: 3, kind: input, shape index: {}]   ;;  %s1673_s2 = inlined_call_operand.vmem [shape: f32[1,128], index: 2, kind: input, shape index: {}]   ;;  %s1674_s5 = inlined_call_operand.vmem [shape: bf16[128,512], index: 5, kind: input, shape index: {}]   ;;  %s1675_s4 = inlined_call_operand.vmem [shape: f32[1,128], index: 4, kind: input, shape index: {}]   ;;  %s1676_s6 = inlined_call_operand.vmem [shape: f32[1,512], index: 6, kind: input, shape index: {}]   ;;  %s1677_s7 = inlined_call_operand.vmem [shape: f32[2,16,512], index: 7, kind: output, shape index: {}]  }
   0x1   :  { %v36_v0 = vld [vmem:[%s1670_s0] sm:$0xff]  ;;  %v37_v1 = vld [vmem:[%s1670_s0 + $0x8] sm:$0xff]  ;;  %29 = vst.msk [vmem:[#allocation2 + $0x11] sm:$0x1] %vm27_vm1, %v1265_v2  ;;  %32 = vst.msk [vmem:[#allocation2 + $0x12] sm:$0x1] %vm27_vm1, %v1265_v2  ;;  %204 = vmatprep.subr.bf16.mxu0 %v1266_v4 }
   0x2   :  { %v1011_v3 = vld [vmem:[%s1670_s0 + $0x10] sm:$0xff]  ;;  %28 = vst.msk [vmem:[#allocation2] sm:$0x1] %vm27_vm1, %v1265_v2  ;;  %30 = vst [vmem:[#allocation3] sm:$0x1] %v1265_v2  ;;  %v1012_v5 = vld [vmem:[%s1670_s0 + $0x18] sm:$0xff] }
   0x3   :  { %31 = vst [vmem:[#allocation3 + $0x11] sm:$0x1] %v1265_v2  ;;  %33 = vst.msk [vmem:[#allocation2 + $0x23] sm:$0x1] %vm27_vm1, %v1265_v2  ;;  %v1181_v6 = vld [vmem:[%s1671_s1] sm:$0xff]   ;;  %v1182_v7 = vld [vmem:[%s1671_s1 + $0x8] sm:$0xff]  }
   0x4   :  { %34 = vst [vmem:[#allocation3 + $0x12] sm:$0x1] %v1265_v2  ;;  %35 = vst [vmem:[#allocation3 + $0x23] sm:$0x1] %v1265_v2  ;;  %205 = vmatpush1.bf16.msra.mxu0 %v1181_v6  ;;  %v1183_v8 = vld [vmem:[%s1671_s1 + $0x10] sm:$0xff]   ;;  %s1267_s0 = smov 64  }
   0x5   :  { %39 = vst.msk [vmem:[#allocation2 + $0x1] sm:$0xff] %vm38_vm0, %v36_v0  ;;  %40 = vst.msk [vmem:[#allocation2 + $0x9] sm:$0xff] %vm38_vm0, %v37_v1  ;;  %206 = vmatprep.subr.bf16.mxu0 %v1266_v4  ;;  %v1184_v16 = vld [vmem:[%s1671_s1 + $0x18] sm:$0xff]   ;;  %v1185_v19 = vld [vmem:[%s1671_s1 + $0x20] sm:$0xff]   ;;  %vm1268_vm2 = vmmov 0   ;;  %vm969_vm3 = vcmask 1045504  }
   0x6   :  { %44 = vst.msk [vmem:[#allocation2 + $0x13] sm:$0xff] %vm38_vm0, %v1011_v3  ;;  %45 = vst.msk [vmem:[#allocation2 + $0x1b] sm:$0xff] %vm38_vm0, %v1012_v5  ;;  %v1186_v21 = vld [vmem:[%s1671_s1 + $0x28] sm:$0xff]   ;;  %v1193_v22 = vld [vmem:[%s1672_s3 + $0x40] sm:$0xff]  }
   0x7   :  { %v1194_v23 = vld [vmem:[%s1672_s3] sm:$0xff]   ;;  %v1187_v24 = vld [vmem:[%s1671_s1 + $0x30] sm:$0xff]   ;;  %1094 = vmatprep.subr.bf16.mxu1 %v1193_v22  ;;  %v1195_v25 = vld [vmem:[%s1672_s3 + $0x48] sm:$0xff]  }
   0x8   :  { %207 = vmatpush1.bf16.msra.mxu0 %v1182_v7  ;;  %1095 = vmatpush3.bf16.msra.mxu1 %v1194_v23  ;;  %v1196_v26 = vld [vmem:[%s1672_s3 + $0x8] sm:$0xff]   ;;  %v1197_v27 = vld [vmem:[%s1672_s3 + $0x50] sm:$0xff]   ;;  %v1188_v28 = vld [vmem:[%s1671_s1 + $0x38] sm:$0xff]  }
   0x9   :  { %208 = vmatprep.subr.bf16.mxu0 %v1266_v4  ;;  %1096 = vmatprep.subr.bf16.mxu1 %v1195_v25  ;;  %v1198_v29 = vld [vmem:[%s1672_s3 + $0x10] sm:$0xff]   ;;  %v1199_v30 = vld [vmem:[%s1672_s3 + $0x58] sm:$0xff]   ;;  %v1189_v32 = vld [vmem:[%s1671_s1 + $0x40] sm:$0xff]  }
   0xa   :  { %v1200_v31 = vld [vmem:[%s1672_s3 + $0x18] sm:$0xff]   ;;  %v1190_v33 = vld [vmem:[%s1671_s1 + $0x48] sm:$0xff]   ;;  %v1191_v34 = vld [vmem:[%s1671_s1 + $0x50] sm:$0xff]  }
   0xb   :  { %v1192_v35 = vld [vmem:[%s1671_s1 + $0x58] sm:$0xff]   ;;  %v1201_v61 = vld [vmem:[%s1672_s3 + $0x60] sm:$0xff]   ;;  %v1203_v63 = vld [vmem:[%s1672_s3 + $0x68] sm:$0xff]  }
   0xc   :  { %v51_v9 = vld [vmem:[#allocation2 + $0x1] sm:$0xff]  ;;  %v52_v10 = vld [vmem:[#allocation2 + $0x9] sm:$0xff]  ;;  %209 = vmatpush1.bf16.msra.mxu0 %v1183_v8  ;;  %1097 = vmatpush3.bf16.msra.mxu1 %v1196_v26  ;;  %v1207_v5 = vld [vmem:[%s1672_s3 + $0x78] sm:$0xff]  }
   0xd   :  { %v53_v11 = vld [vmem:[#allocation2 + $0x11] sm:$0xff]  ;;  %v1171_v12 = vpack.i.bf16 %v52_v10, %v51_v9  ;;  %v54_v13 = vld [vmem:[#allocation2 + $0x19] sm:$0xff]  ;;  %v55_v14 = vld [vmem:[#allocation2 + $0x21] sm:$0x3]  ;;  %210 = vmatprep.subr.bf16.mxu0 %v1266_v4  ;;  %1098 = vmatprep.subr.bf16.mxu1 %v1197_v27 }
   0xe   :  { %74 = vrot.lane.b32.xlu1 %v55_v14, %s1267_s0  ;;  %v1176_v15 = vpack.i.bf16 %v54_v13, %v53_v11  ;;  %v56_v17 = vld [vmem:[#allocation2 + $0x2] sm:$0xff]  ;;  %v57_v18 = vld [vmem:[#allocation2 + $0xa] sm:$0xff]  ;;  %v58_v39 = vld [vmem:[#allocation2 + $0x12] sm:$0xff] }
   0xf   :  { %1172 = vrot.lane.b32.xlu0 %v1171_v12, %s1267_s0  ;;  %v87_v20 = vpack.c.bf16 %v57_v18, %v56_v17  ;;  %v46_v36 = vld [vmem:[#allocation2] sm:$0xff]  ;;  %v47_v38 = vld [vmem:[#allocation2 + $0x8] sm:$0xff]  ;;  %v48_v48 = vld [vmem:[#allocation2 + $0x10] sm:$0xff] }
  0x10   :  { %211 = vmatpush1.bf16.msra.mxu0 %v1184_v16  ;;  %1099 = vmatpush3.bf16.msra.mxu1 %v1198_v29  ;;  %v59_v40 = vld [vmem:[#allocation2 + $0x1a] sm:$0xff]  ;;  %v60_v54 = vld [vmem:[#allocation2 + $0x22] sm:$0x3]  ;;  %v1204_v0 = vld [vmem:[%s1672_s3 + $0x28] sm:$0xff]  }
  0x11   :  { %212 = vmatprep.subr.bf16.mxu0 %v1266_v4  ;;  %1026 = vmatprep.mubr.msk.bf16.mxu0 %vm38_vm0, %v87_v20  ;;  %v89_v45 = vpack.c.bf16 %v59_v40, %v58_v39  ;;  %v49_v49 = vld [vmem:[#allocation2 + $0x18] sm:$0xff]  ;;  %v91_v56 = vpack.c.bf16 %v60_v54, %v60_v54  ;;  %v50_v58 = vld [vmem:[#allocation2 + $0x20] sm:$0x3]  ;;  %v1205_v1 = vld [vmem:[%s1672_s3 + $0x70] sm:$0xff]  }
  0x12   :  { %1100 = vmatprep.subr.bf16.mxu1 %v1199_v30  ;;  %v1202_v62 = vld [vmem:[%s1672_s3 + $0x20] sm:$0xff]   ;;  %v1206_v3 = vld [vmem:[%s1672_s3 + $0x30] sm:$0xff]   ;;  %v1208_v6 = vld [vmem:[%s1672_s3 + $0x38] sm:$0xff]  }
  0x13   :  { %1177 = vrot.lane.b32.xlu0 %v1176_v15, %s1267_s0  ;;  %v1013_v7 = vld [vmem:[%s1673_s2] ss:$0 sm:$0xff]  ;;  %v1211_v40 = vld [vmem:[%s1672_s3 + $0x90] sm:$0xff]  }
  0x14   :  { %213 = vmatpush1.bf16.msra.mxu0 %v1185_v19  ;;  %1101 = vmatpush3.bf16.msra.mxu1 %v1200_v31  ;;  %v1209_v27 = vld [vmem:[%s1672_s3 + $0x80] sm:$0xff]  }
  0x15   :  { %214 = vmatprep.subr.bf16.mxu0 %v1266_v4  ;;  %1102 = vmatprep.subr.bf16.mxu1 %v1201_v61  ;;  %v1220_v61 = vld [vmem:[%s1674_s5 + $0x8] ss:$16 sps:$4 sm:$0xff]  }
  0x18   :  { %215 = vmatpush1.bf16.msra.mxu0 %v1186_v21  ;;  %1103 = vmatpush3.bf16.msra.mxu1 %v1202_v62  ;;  %v1225_v62 = vld [vmem:[%s1674_s5 + $0x24] ss:$16 sps:$4 sm:$0xff]  }
  0x19   :  { %216 = vmatprep.subr.bf16.mxu0 %v1266_v4  ;;  %1104 = vmatprep.subr.bf16.mxu1 %v1203_v63  ;;  %v1228_v63 = vld [vmem:[%s1674_s5 + $0x2c] ss:$16 sps:$4 sm:$0xff]  }
  0x1c   :  { %217 = vmatpush1.bf16.msra.mxu0 %v1187_v24  ;;  %1105 = vmatpush3.bf16.msra.mxu1 %v1204_v0  ;;  %v1223_v0 = vld [vmem:[%s1674_s5 + $0x20] ss:$16 sps:$4 sm:$0xff]  }
  0x1d   :  { %218 = vmatprep.subr.bf16.mxu0 %v1266_v4  ;;  %1106 = vmatprep.subr.bf16.mxu1 %v1205_v1  ;;  %v1226_v1 = vld [vmem:[%s1674_s5 + $0x28] ss:$16 sps:$4 sm:$0xff]  }
  0x20   :  { %219 = vmatpush1.bf16.msra.mxu0 %v1188_v28  ;;  %1107 = vmatpush3.bf16.msra.mxu1 %v1206_v3  ;;  %v1231_v3 = vld [vmem:[%s1674_s5 + $0x44] ss:$16 sps:$4 sm:$0xff]  }
  0x21   :  { %220 = vmatprep.subr.bf16.mxu0 %v1266_v4  ;;  %1108 = vmatprep.subr.bf16.mxu1 %v1207_v5  ;;  %v1234_v5 = vld [vmem:[%s1674_s5 + $0x4c] ss:$16 sps:$4 sm:$0xff]  }
  0x24   :  { %221 = vmatpush1.bf16.msra.mxu0 %v1189_v32  ;;  %1109 = vmatpush3.bf16.msra.mxu1 %v1208_v6  ;;  %v1210_v32 = vld [vmem:[%s1672_s3 + $0x88] sm:$0xff]   ;;  %v1229_v6 = vld [vmem:[%s1674_s5 + $0x40] ss:$16 sps:$4 sm:$0xff]  }
  0x25   :  { %222 = vmatprep.subr.bf16.mxu0 %v1266_v4  ;;  %1139 = vmatprep.subr.bf16.mxu1 %v1265_v2 }
  0x28   :  { %223 = vmatpush1.bf16.msra.mxu0 %v1190_v33 }
  0x29   :  { %224 = vmatprep.subr.bf16.mxu0 %v1266_v4 }
  0x2c   :  { %225 = vmatpush1.bf16.msra.mxu0 %v1191_v34 }
  0x2d   :  { %226 = vmatprep.subr.bf16.mxu0 %v1266_v4 }
  0x30   :  { %227 = vmatpush1.bf16.msra.mxu0 %v1192_v35 }
  0x80   :  { %v75_v57 = vpop.permute.xlu1 %74 }
  0x81   :  { %v1173_v37 = vpop.permute.xlu0 %1172  ;;  %v85_v59 = vsel %vm38_vm0, %v50_v58, %v75_v57 }
  0x82   :  { %v1175_v41 = vunpack.i.h.bf16 %v1173_v37  ;;  %v1174_v42 = vunpack.i.l.bf16 %v1173_v37  ;;  %v90_v60 = vpack.c.bf16 %v85_v59, %v85_v59  ;;  %v1219_v59 = vld [vmem:[%s1674_s5 + $0x4] ss:$16 sps:$4 sm:$0xff]  }
  0x83   :  { %827 = vmatprep.subr.bf16.mxu0 %v1219_v59 }
  0x84   :  { %v81_v43 = vsel %vm38_vm0, %v46_v36, %v1174_v42  ;;  %v82_v44 = vsel %vm38_vm0, %v47_v38, %v1175_v41  ;;  %v1212_v42 = vld [vmem:[%s1672_s3 + $0x98] sm:$0xff]  }
  0x85   :  { %v86_v46 = vpack.c.bf16 %v82_v44, %v81_v43  ;;  %v1178_v47 = vpop.permute.xlu0 %1177 }
  0x86   :  { %v1180_v50 = vunpack.i.h.bf16 %v1178_v47  ;;  %v1179_v51 = vunpack.i.l.bf16 %v1178_v47 }
  0x87   :  { %237 = vmatmul.mubr.bf16.vlgmr.msra.gmra.mrb[0].mxu0 %v86_v46  ;;  %v1213_v46 = vld [vmem:[%s1672_s3 + $0xa0] sm:$0xff]  }
  0x88   :  { %1027 = vmatprep.mubr.msk.bf16.mxu0 %vm38_vm0, %v89_v45  ;;  %v83_v52 = vsel %vm38_vm0, %v48_v48, %v1179_v51  ;;  %v84_v53 = vsel %vm38_vm0, %v49_v49, %v1180_v50  ;;  %v1214_v48 = vld [vmem:[%s1672_s3 + $0xa8] sm:$0xff]   ;;  %v1215_v49 = vld [vmem:[%s1672_s3 + $0xb0] sm:$0xff]   ;;  %v1216_v50 = vld [vmem:[%s1672_s3 + $0xb8] sm:$0xff]  }
  0x89   :  { %v88_v55 = vpack.c.bf16 %v84_v53, %v83_v52 }
  0x8f   :  { %245 = vmatmul.mubr.bf16.gmra.mrb[4].mxu0 %v88_v55 }
  0x90   :  { %1028 = vmatprep.mubr.msk.bf16.mxu0 %vm38_vm0, %v91_v56 }
  0x97   :  { %253 = vmatmul.mubr.bf16.gmra.mrb[8].mxu0 %v90_v60  ;;  %v1217_v60 = vld [vmem:[%s1674_s5] ss:$16 sps:$4 sm:$0xff]  }
  0x98   :  { %859 = vmatprep.mubr.bf16.mxu0 %v1266_v4  ;;  %828 = vmatpush1.bf16.msra.mxu0 %v1217_v60 }
  0x99   :  { %829 = vmatprep.subr.bf16.mxu0 %v1225_v62 }
  0x9c   :  { %830 = vmatpush1.bf16.msra.mxu0 %v1223_v0 }
  0x9d   :  { %831 = vmatprep.subr.bf16.mxu0 %v1231_v3 }
  0xa0   :  { %832 = vmatpush1.bf16.msra.mxu0 %v1229_v6 }
 0x15a   :  { %v238_v8 = vpop.f32.mrb[0].mxu0 }
 0x15b   :  { %v239_v9 = vadd.f32 %v1013_v7, %v238_v8  ;;  %v240_v10 = vpop.f32.mrb[1].mxu0  ;;  %v1235_v8 = vld [vmem:[%s1674_s5 + $0x60] ss:$16 sps:$4 sm:$0xff]  }
 0x15c   :  { %v241_v11 = vpop.f32.mrb[2].mxu0  ;;  %v1238_v10 = vld [vmem:[%s1674_s5 + $0x68] ss:$16 sps:$4 sm:$0xff]  }
 0x15d   :  { %v260_v12 = vmax.f32 %v239_v9, 0.0  ;;  %v242_v13 = vadd.f32 %v1013_v7, %v241_v11  ;;  %v243_v14 = vpop.f32.mrb[3].mxu0  ;;  %v1237_v9 = vld [vmem:[%s1674_s5 + $0x64] ss:$16 sps:$4 sm:$0xff]   ;;  %v1240_v11 = vld [vmem:[%s1674_s5 + $0x6c] ss:$16 sps:$4 sm:$0xff]  }
 0x15e   :  { %833 = vmatprep.subr.bf16.mxu0 %v1237_v9  ;;  %v1241_v14 = vld [vmem:[%s1674_s5 + $0x80] ss:$16 sps:$4 sm:$0xff]  }
 0x15f   :  { %265 = vst [vmem:[#allocation3 + $0x1] sm:$0xff] %v260_v12  ;;  %v261_v15 = vmax.f32 %v242_v13, 0.0  ;;  %v1246_v13 = vld [vmem:[%s1674_s5 + $0x8c] ss:$16 sps:$4 sm:$0xff]   ;;  %834 = vmatpush1.bf16.msra.mxu0 %v1235_v8 }
 0x161   :  { %266 = vst [vmem:[#allocation3 + $0x9] sm:$0xff] %v261_v15  ;;  %v286_v16 = vpack.c.bf16 %v261_v15, %v260_v12  ;;  %v1243_v12 = vld [vmem:[%s1674_s5 + $0x84] ss:$16 sps:$4 sm:$0xff]   ;;  %v1244_v15 = vld [vmem:[%s1674_s5 + $0x88] ss:$16 sps:$4 sm:$0xff]  }
 0x162   :  { %v246_v17 = vpop.f32.mrb[4].mxu0  ;;  %835 = vmatprep.subr.bf16.mxu0 %v1243_v12 }
 0x163   :  { %v247_v18 = vadd.f32 %v1013_v7, %v246_v17  ;;  %v248_v19 = vpop.f32.mrb[5].mxu0  ;;  %525 = vmatprep.mubr.bf16.mxu1 %v286_v16  ;;  %v1249_v16 = vld [vmem:[%s1674_s5 + $0xa4] ss:$16 sps:$4 sm:$0xff]   ;;  %v1252_v17 = vld [vmem:[%s1674_s5 + $0xac] ss:$16 sps:$4 sm:$0xff]   ;;  %836 = vmatpush1.bf16.msra.mxu0 %v1241_v14 }
 0x164   :  { %v249_v20 = vpop.f32.mrb[6].mxu0  ;;  %837 = vmatprep.subr.bf16.mxu0 %v1249_v16  ;;  %v1250_v19 = vld [vmem:[%s1674_s5 + $0xa8] ss:$16 sps:$4 sm:$0xff]  }
 0x165   :  { %v262_v21 = vmax.f32 %v247_v18, 0.0  ;;  %v250_v22 = vadd.f32 %v1013_v7, %v249_v20  ;;  %v251_v23 = vpop.f32.mrb[7].mxu0  ;;  %v1247_v18 = vld [vmem:[%s1674_s5 + $0xa0] ss:$16 sps:$4 sm:$0xff]   ;;  %v1255_v20 = vld [vmem:[%s1674_s5 + $0xc4] ss:$16 sps:$4 sm:$0xff]  }
 0x166   :  { %v270_v25 = vld [vmem:[#allocation3] sm:$0xff] }
 0x167   :  { %267 = vst [vmem:[#allocation3 + $0x11] sm:$0xfc] %v262_v21  ;;  %v263_v24 = vmax.f32 %v250_v22, 0.0  ;;  %838 = vmatpush1.bf16.msra.mxu0 %v1247_v18  ;;  %v1258_v21 = vld [vmem:[%s1674_s5 + $0xcc] ss:$16 sps:$4 sm:$0xff]  }
 0x168   :  { %v271_v26 = vld [vmem:[#allocation3 + $0x8] sm:$0xff]  ;;  %v1256_v23 = vld [vmem:[%s1674_s5 + $0xc8] ss:$16 sps:$4 sm:$0xff]   ;;  %839 = vmatprep.subr.bf16.mxu0 %v1255_v20 }
 0x169   :  { %268 = vst [vmem:[#allocation3 + $0x19] sm:$0xff] %v263_v24  ;;  %v285_v28 = vpack.c.bf16 %v271_v26, %v270_v25  ;;  %v280_v51 = vld [vmem:[#allocation3 + $0x2] sm:$0xff]  ;;  %v281_v52 = vld [vmem:[#allocation3 + $0xa] sm:$0xff] }
 0x16a   :  { %v254_v29 = vpop.f32.mrb[8].mxu0  ;;  %v287_v53 = vpack.c.bf16 %v281_v52, %v280_v51  ;;  %v1253_v22 = vld [vmem:[%s1674_s5 + $0xc0] ss:$16 sps:$4 sm:$0xff]   ;;  %v1264_v25 = vld [vmem:[%s1674_s5 + $0xec] ss:$16 sps:$4 sm:$0xff]  }
 0x16b   :  { %v255_v30 = vadd.f32 %v1013_v7, %v254_v29  ;;  %526 = vmatmul.mubr.bf16.vlgmr.msra.gmra.mrb[0].mxu1 %v285_v28  ;;  %v256_v31 = vpop.f32.mrb[9].mxu0  ;;  %v1232_v7 = vld [vmem:[%s1674_s5 + $0x48] ss:$16 sps:$4 sm:$0xff]   ;;  %840 = vmatpush1.bf16.msra.mxu0 %v1253_v22  ;;  %v1259_v26 = vld [vmem:[%s1674_s5 + $0xe0] ss:$16 sps:$4 sm:$0xff]  }
 0x16c   :  { %1140 = vmatpush3.bf16.msra.mxu1 %v1209_v27  ;;  %v257_v33 = vpop.f32.mrb[10].mxu0  ;;  %v1262_v27 = vld [vmem:[%s1674_s5 + $0xe8] ss:$16 sps:$4 sm:$0xff]  }
 0x16d   :  { %v264_v34 = vmax.f32 %v255_v30, 0.0  ;;  %1141 = vmatprep.subr.bf16.mxu1 %v1265_v2  ;;  %v258_v35 = vpop.f32.mrb[11].mxu0 }
 0x16e   :  { %v277_v36 = vld [vmem:[#allocation3 + $0x11] sm:$0xff] }
 0x16f   :  { %269 = vst [vmem:[#allocation3 + $0x21] sm:$0x3] %v264_v34  ;;  %v289_v37 = vpack.c.bf16 %v263_v24, %v277_v36  ;;  %v272_v38 = vld [vmem:[#allocation3 + $0x10] sm:$0xff]  ;;  %v1261_v24 = vld [vmem:[%s1674_s5 + $0xe4] ss:$16 sps:$4 sm:$0xff]  }
 0x170   :  { %1142 = vmatpush3.bf16.msra.mxu1 %v1210_v32  ;;  %v273_v39 = vld [vmem:[#allocation3 + $0x18] sm:$0xff]  ;;  %841 = vmatprep.subr.bf16.mxu0 %v1261_v24 }
 0x171   :  { %533 = vmatprep.mubr.bf16.mxu1 %v289_v37  ;;  %1143 = vmatprep.subr.bf16.mxu1 %v1265_v2  ;;  %v288_v41 = vpack.c.bf16 %v273_v39, %v272_v38  ;;  %v282_v54 = vld [vmem:[#allocation3 + $0x12] sm:$0xff] }
 0x172   :  { %842 = vmatpush1.bf16.msra.mxu0 %v1259_v26 }
 0x173   :  { %534 = vmatmul.mubr.bf16.gmra.mrb[4].mxu1 %v288_v41 }
 0x174   :  { %1144 = vmatpush3.bf16.msra.mxu1 %v1211_v40 }
 0x175   :  { %1145 = vmatprep.subr.bf16.mxu1 %v1265_v2 }
 0x176   :  { %v279_v43 = vld [vmem:[#allocation3 + $0x21] sm:$0x3] }
 0x177   :  { %v274_v44 = vld [vmem:[#allocation3 + $0x20] sm:$0x3]  ;;  %v292_v45 = vpack.c.bf16 %v279_v43, %v279_v43  ;;  %v284_v57 = vld [vmem:[#allocation3 + $0x22] sm:$0x3] }
 0x178   :  { %1146 = vmatpush3.bf16.msra.mxu1 %v1212_v42  ;;  %v291_v47 = vpack.c.bf16 %v274_v44, %v274_v44  ;;  %v283_v55 = vld [vmem:[#allocation3 + $0x1a] sm:$0xff]  ;;  %v293_v58 = vpack.c.bf16 %v284_v57, %v284_v57 }
 0x179   :  { %541 = vmatprep.mubr.bf16.mxu1 %v292_v45  ;;  %1147 = vmatprep.subr.bf16.mxu1 %v1265_v2  ;;  %v290_v56 = vpack.c.bf16 %v283_v55, %v282_v54  ;;  %v1029_v45 = vld [vmem:[%s1675_s4] ss:$0 sm:$0xff] }
 0x17b   :  { %542 = vmatmul.mubr.bf16.gmra.mrb[8].mxu1 %v291_v47 }
 0x17c   :  { %1148 = vmatpush3.bf16.msra.mxu1 %v1213_v46  ;;  %1155 = vmatprep.mubr.msk.bf16.mxu1 %vm1268_vm2, %v1265_v2 }
 0x17d   :  { %1149 = vmatprep.subr.bf16.mxu1 %v1265_v2 }
 0x180   :  { %1150 = vmatpush3.bf16.msra.mxu1 %v1214_v48 }
 0x181   :  { %1151 = vmatprep.subr.bf16.mxu1 %v1265_v2 }
 0x184   :  { %1152 = vmatpush3.bf16.msra.mxu1 %v1215_v49 }
 0x185   :  { %1153 = vmatprep.subr.bf16.mxu1 %v1265_v2 }
 0x188   :  { %1154 = vmatpush3.bf16.msra.mxu1 %v1216_v50 }
 0x18b   :  { %1156 = vmatmul.mubr.bf16.vlgmr.msra.gmra.mrb[12].mxu1 %v287_v53 }
 0x18c   :  { %1159 = vmatprep.mubr.msk.bf16.mxu1 %vm1268_vm2, %v1265_v2 }
 0x193   :  { %1160 = vmatmul.mubr.bf16.gmra.mrb[16].mxu1 %v290_v56 }
 0x194   :  { %1163 = vmatprep.mubr.msk.bf16.mxu1 %vm1268_vm2, %v1265_v2  ;;  %v1222_v2 = vld [vmem:[%s1674_s5 + $0xc] ss:$16 sps:$4 sm:$0xff]  }
 0x195   :  { %888 = vmatprep.subr.bf16.mxu1 %v1222_v2 }
 0x196   :  { %889 = vmatpush1.bf16.msra.mxu1 %v1220_v61 }
 0x197   :  { %890 = vmatprep.subr.bf16.mxu1 %v1228_v63 }
 0x19a   :  { %891 = vmatpush1.bf16.msra.mxu1 %v1226_v1 }
 0x19b   :  { %1164 = vmatmul.mubr.bf16.gmra.mrb[20].mxu1 %v293_v58  ;;  %892 = vmatprep.subr.bf16.mxu1 %v1234_v5 }
 0x19c   :  { %920 = vmatprep.mubr.bf16.mxu1 %v1266_v4 }
 0x19e   :  { %893 = vmatpush1.bf16.msra.mxu1 %v1232_v7 }
 0x19f   :  { %894 = vmatprep.subr.bf16.mxu1 %v1240_v11 }
 0x1a2   :  { %895 = vmatpush1.bf16.msra.mxu1 %v1238_v10 }
 0x1a3   :  { %896 = vmatprep.subr.bf16.mxu1 %v1246_v13  ;;  %v647_v13 = vlaneseq }
 0x1a5   :  { %v648_v14 = vshrl.u32 %v647_v13, 7 }
 0x1a6   :  { %897 = vmatpush1.bf16.msra.mxu1 %v1244_v15 }
 0x1a7   :  { %898 = vmatprep.subr.bf16.mxu1 %v1252_v17  ;;  %v649_v15 = vsub.s32 0, %v648_v14  ;;  %v657_v16 = vsub.s32 2, %v648_v14  ;;  %v645_v17 = vld [vmem:[%s1676_s6] sm:$0xf]  ;;  %v653_v18 = vsub.s32 1, %v648_v14 }
 0x1a9   :  { %v1586_v20 = vrot.slane %v645_v17, %v649_v15 }
 0x1aa   :  { %899 = vmatpush1.bf16.msra.mxu1 %v1250_v19  ;;  %v661_v19 = vsub.s32 3, %v648_v14 }
 0x1ab   :  { %900 = vmatprep.subr.bf16.mxu1 %v1258_v21  ;;  %v1588_v21 = vrot.slane %v645_v17, %v657_v16 }
 0x1ac   :  { %v1592_v22 = vrot.slane %v645_v17, %v661_v19 }
 0x1ae   :  { %901 = vmatpush1.bf16.msra.mxu1 %v1256_v23 }
 0x1af   :  { %902 = vmatprep.subr.bf16.mxu1 %v1264_v25 }
 0x1b2   :  { %903 = vmatpush1.bf16.msra.mxu1 %v1262_v27 }
 0x23e   :  { %v1110_v28 = vpop.f32.mrb[0].mxu1 }
 0x23f   :  { %v1111_v29 = vpop.f32.mrb[1].mxu1 }
 0x240   :  { %v1112_v30 = vadd.f32 %v1111_v29, %v1110_v28  ;;  %v1113_v31 = vpop.f32.mrb[2].mxu1 }
 0x241   :  { %v1114_v32 = vpop.f32.mrb[3].mxu1 }
 0x242   :  { %v1115_v33 = vadd.f32 %v1114_v32, %v1113_v31  ;;  %v528_v46 = vadd.f32 %v1112_v30, %v1029_v45 }
 0x244   :  { %v531_v50 = vadd.f32 %v1115_v33, %v1029_v45 }
 0x246   :  { %v1116_v34 = vpop.f32.mrb[4].mxu1 }
 0x247   :  { %v1117_v35 = vpop.f32.mrb[5].mxu1 }
 0x248   :  { %v1118_v36 = vadd.f32 %v1117_v35, %v1116_v34  ;;  %v1119_v37 = vpop.f32.mrb[6].mxu1 }
 0x249   :  { %v1120_v38 = vpop.f32.mrb[7].mxu1 }
 0x24a   :  { %v1121_v39 = vadd.f32 %v1120_v38, %v1119_v37  ;;  %v536_v57 = vadd.f32 %v1118_v36, %v1029_v45 }
 0x24c   :  { %v539_v61 = vadd.f32 %v1121_v39, %v1029_v45 }
 0x24e   :  { %v1122_v40 = vpop.f32.mrb[8].mxu1 }
 0x24f   :  { %v1123_v41 = vpop.f32.mrb[9].mxu1 }
 0x250   :  { %v1124_v42 = vadd.f32 %v1123_v41, %v1122_v40  ;;  %v1125_v43 = vpop.f32.mrb[10].mxu1 }
 0x251   :  { %v1126_v44 = vpop.f32.mrb[11].mxu1 }
 0x252   :  { %v544_v5 = vadd.f32 %v1124_v42, %v1029_v45 }
 0x25e   :  { %v583_v47 = vpop.f32.mrb[12].mxu1 }
 0x25f   :  { %v584_v48 = vadd.f32 %v583_v47, %v528_v46  ;;  %v1157_v49 = vpop.f32.mrb[13].mxu1 }
 0x260   :  { %v586_v51 = vpop.f32.mrb[14].mxu1 }
 0x261   :  { %v587_v52 = vadd.f32 %v586_v51, %v531_v50  ;;  %v1158_v53 = vpop.f32.mrb[15].mxu1  ;;  %v605_v54 = vmax.f32 %v584_v48, 0.0 }
 0x263   :  { %v606_v55 = vmax.f32 %v587_v52, 0.0 }
 0x265   :  { %v610_v56 = vpack.c.bf16 %v606_v55, %v605_v54 }
 0x266   :  { %v591_v58 = vpop.f32.mrb[16].mxu1 }
 0x267   :  { %v592_v59 = vadd.f32 %v591_v58, %v536_v57  ;;  %v1161_v60 = vpop.f32.mrb[17].mxu1  ;;  %860 = vmatmul.mubr.bf16.vlgmr.msra.gmra.mrb[12].mxu0 %v610_v56  ;;  %921 = vmatmul.mubr.bf16.vlgmr.msra.gmra.mrb[24].mxu1 %v610_v56 }
 0x268   :  { %v594_v2 = vpop.f32.mrb[18].mxu1  ;;  %869 = vmatprep.mubr.bf16.mxu0 %v1266_v4  ;;  %930 = vmatprep.mubr.bf16.mxu1 %v1266_v4 }
 0x269   :  { %v595_v62 = vadd.f32 %v594_v2, %v539_v61  ;;  %v1162_v63 = vpop.f32.mrb[19].mxu1  ;;  %v607_v0 = vmax.f32 %v592_v59, 0.0 }
 0x26b   :  { %v608_v1 = vmax.f32 %v595_v62, 0.0 }
 0x26d   :  { %v611_v3 = vpack.c.bf16 %v608_v1, %v607_v0 }
 0x26e   :  { %v599_v6 = vpop.f32.mrb[20].mxu1 }
 0x26f   :  { %v600_v7 = vadd.f32 %v599_v6, %v544_v5  ;;  %v1165_v8 = vpop.f32.mrb[21].mxu1  ;;  %870 = vmatmul.mubr.bf16.gmra.mrb[16].mxu0 %v611_v3  ;;  %931 = vmatmul.mubr.bf16.gmra.mrb[28].mxu1 %v611_v3 }
 0x270   :  { %v602_v9 = vpop.f32.mrb[22].mxu1  ;;  %879 = vmatprep.mubr.bf16.mxu0 %v1266_v4  ;;  %940 = vmatprep.mubr.bf16.mxu1 %v1266_v4  ;;  %v1590_v4 = vrot.slane %v645_v17, %v653_v18 }
 0x271   :  { %v609_v10 = vmax.f32 %v600_v7, 0.0  ;;  %v1166_v11 = vpop.f32.mrb[23].mxu1 }
 0x273   :  { %v612_v12 = vpack.c.bf16 %v609_v10, %v609_v10 }
 0x277   :  { %880 = vmatmul.mubr.bf16.gmra.mrb[20].mxu0 %v612_v12  ;;  %941 = vmatmul.mubr.bf16.gmra.mrb[32].mxu1 %v612_v12 }
 0x33a   :  { %v861_v23 = vpop.f32.mrb[12].mxu0  ;;  %v922_v24 = vpop.f32.mrb[24].mxu1 }
 0x33b   :  { %v862_v25 = vadd.f32 %v861_v23, %v1586_v20  ;;  %v923_v26 = vadd.f32 %v922_v24, %v1588_v21  ;;  %v863_v27 = vpop.f32.mrb[13].mxu0  ;;  %v924_v28 = vpop.f32.mrb[25].mxu1 }
 0x33c   :  { %v864_v29 = vadd.f32 %v863_v27, %v1590_v4  ;;  %v925_v30 = vadd.f32 %v924_v28, %v1592_v22  ;;  %v865_v31 = vpop.f32.mrb[14].mxu0  ;;  %v926_v32 = vpop.f32.mrb[26].mxu1 }
 0x33d   :  { %949 = vst [vmem:[%s1677_s7] sm:$0xff] %v862_v25  ;;  %951 = vst [vmem:[%s1677_s7 + $0x10] sm:$0xff] %v923_v26  ;;  %v866_v33 = vadd.f32 %v865_v31, %v1586_v20  ;;  %v927_v34 = vadd.f32 %v926_v32, %v1588_v21  ;;  %v867_v35 = vpop.f32.mrb[15].mxu0  ;;  %v928_v36 = vpop.f32.mrb[27].mxu1 }
 0x33e   :  { %950 = vst [vmem:[%s1677_s7 + $0x8] sm:$0xff] %v864_v29  ;;  %952 = vst [vmem:[%s1677_s7 + $0x18] sm:$0xff] %v925_v30  ;;  %v868_v37 = vadd.f32 %v867_v35, %v1590_v4  ;;  %v929_v38 = vadd.f32 %v928_v36, %v1592_v22 }
 0x33f   :  { %953 = vst [vmem:[%s1677_s7 + $0x20] sm:$0xff] %v866_v33  ;;  %955 = vst [vmem:[%s1677_s7 + $0x30] sm:$0xff] %v927_v34 }
 0x340   :  { %954 = vst [vmem:[%s1677_s7 + $0x28] sm:$0xff] %v868_v37  ;;  %956 = vst [vmem:[%s1677_s7 + $0x38] sm:$0xff] %v929_v38 }
 0x342   :  { %v871_v39 = vpop.f32.mrb[16].mxu0  ;;  %v932_v40 = vpop.f32.mrb[28].mxu1 }
 0x343   :  { %v872_v41 = vadd.f32 %v871_v39, %v1586_v20  ;;  %v933_v42 = vadd.f32 %v932_v40, %v1588_v21  ;;  %v873_v43 = vpop.f32.mrb[17].mxu0  ;;  %v934_v44 = vpop.f32.mrb[29].mxu1 }
 0x344   :  { %v874_v45 = vadd.f32 %v873_v43, %v1590_v4  ;;  %v935_v46 = vadd.f32 %v934_v44, %v1592_v22  ;;  %v875_v47 = vpop.f32.mrb[18].mxu0  ;;  %v936_v48 = vpop.f32.mrb[30].mxu1 }
 0x345   :  { %v876_v49 = vadd.f32 %v875_v47, %v1586_v20  ;;  %v937_v50 = vadd.f32 %v936_v48, %v1588_v21  ;;  %v877_v51 = vpop.f32.mrb[19].mxu0  ;;  %v938_v52 = vpop.f32.mrb[31].mxu1  ;;  %v970_v55 = vrot.slane %v872_v41, 2  ;;  %v976_v56 = vrot.slane %v933_v42, 2 }
 0x346   :  { %v878_v53 = vadd.f32 %v877_v51, %v1590_v4  ;;  %v939_v54 = vadd.f32 %v938_v52, %v1592_v22  ;;  %v973_v59 = vrot.slane %v874_v45, 2  ;;  %v979_v60 = vrot.slane %v935_v46, 2 }
 0x347   :  { %v971_v57 = vrot.slane %v876_v49, 2  ;;  %v977_v58 = vrot.slane %v937_v50, 2 }
 0x348   :  { %v974_v61 = vrot.slane %v878_v53, 2  ;;  %v980_v2 = vrot.slane %v939_v54, 2 }
 0x349   :  { %v972_v62 = vsel %vm969_vm3, %v970_v55, %v971_v57  ;;  %v978_v63 = vsel %vm969_vm3, %v976_v56, %v977_v58 }
 0x34a   :  { %1086 = vst [vmem:[%s1677_s7 + $0x40] sm:$0xff] %v972_v62  ;;  %1088 = vst [vmem:[%s1677_s7 + $0x50] sm:$0xff] %v978_v63  ;;  %v975_v0 = vsel %vm969_vm3, %v973_v59, %v974_v61  ;;  %v981_v1 = vsel %vm969_vm3, %v979_v60, %v980_v2  ;;  %v881_v3 = vpop.f32.mrb[20].mxu0  ;;  %v942_v5 = vpop.f32.mrb[32].mxu1 }
 0x34b   :  { %1087 = vst [vmem:[%s1677_s7 + $0x48] sm:$0xff] %v975_v0  ;;  %1089 = vst [vmem:[%s1677_s7 + $0x58] sm:$0xff] %v981_v1  ;;  %v882_v6 = vadd.f32 %v881_v3, %v1586_v20  ;;  %v943_v7 = vadd.f32 %v942_v5, %v1588_v21  ;;  %v883_v8 = vpop.f32.mrb[21].mxu0  ;;  %v944_v9 = vpop.f32.mrb[33].mxu1 }
 0x34c   :  { %v884_v10 = vadd.f32 %v883_v8, %v1590_v4  ;;  %v945_v11 = vadd.f32 %v944_v9, %v1592_v22  ;;  %v885_v12 = vpop.f32.mrb[22].mxu0  ;;  %v946_v13 = vpop.f32.mrb[34].mxu1 }
 0x34d   :  { %v982_v14 = vrot.slane %v882_v6, 2  ;;  %v986_v15 = vrot.slane %v943_v7, 2  ;;  %v886_v16 = vpop.f32.mrb[23].mxu0  ;;  %v947_v17 = vpop.f32.mrb[35].mxu1 }
 0x34e   :  { %v984_v18 = vrot.slane %v884_v10, 2  ;;  %v988_v19 = vrot.slane %v945_v11, 2 }
 0x34f   :  { %v983_v23 = vsel %vm969_vm3, %v971_v57, %v982_v14  ;;  %v987_v20 = vsel %vm969_vm3, %v977_v58, %v986_v15 }
 0x350   :  { %1090 = vst [vmem:[%s1677_s7 + $0x60] sm:$0xff] %v983_v23  ;;  %1092 = vst [vmem:[%s1677_s7 + $0x70] sm:$0xff] %v987_v20  ;;  %v985_v21 = vsel %vm969_vm3, %v974_v61, %v984_v18  ;;  %v989_v4 = vsel %vm969_vm3, %v980_v2, %v988_v19 }
 0x351   :  { %1091 = vst [vmem:[%s1677_s7 + $0x68] sm:$0xff] %v985_v21  ;;  %1093 = vst [vmem:[%s1677_s7 + $0x78] sm:$0xff] %v989_v4 }

</bundles_post_ra>
